<compile_context>
chip_gen: v5e
topology: v5e:2x2
jax: 0.10.0
libtpu: 0.0.40
codegen_flags: <defaults>
</compile_context>

<pallas_src>
import functools

import jax
import jax.numpy as jnp
from jax import lax
from jax.experimental import pallas as pl
from jax.experimental.pallas import tpu as pltpu

_LANE = 128
_EPS = 1e-5
_NEG_SLOPE = 0.2


# ----------------------------------------------------------------------------
# VMEM planning (generation-aware)
# ----------------------------------------------------------------------------
@functools.lru_cache(maxsize=None)
def _vmem_capacity_bytes():
    """Physical VMEM per core (v5e/v6e: 128 MiB, v7x: 64 MiB); safe fallback."""
    try:
        cap = int(getattr(pltpu.get_tpu_info(), "vmem_capacity_bytes", 0))
        if cap > 0:
            return cap
    except Exception:
        pass
    return 64 * 1024 * 1024


def _plan_block(m, kdim, c_out, in_bytes, out_bytes):
    """Return (single_tile, tile_m, n_tiles, m_pad, vmem_limit_bytes)."""
    cap = _vmem_capacity_bytes()
    vmem_limit = min(int(cap * 0.75), cap - (4 << 20))
    budget = int(cap * 0.55)

    # Fully fused single launch if everything (plus f32 temporaries) fits.
    single = (kdim * m * in_bytes + c_out * kdim * in_bytes
              + c_out * m * out_bytes + 3 * c_out * m * 4)
    if 2 * single <= budget:
        return True, m, 1, m, vmem_limit

    # Multi-tile: largest lane-dense tile that fits double-buffered.
    per_col = 2 * (kdim * in_bytes + c_out * out_bytes) + 4 * c_out
    fixed = 2 * c_out * kdim * in_bytes + 4 * c_out * 4
    tile_m = max(_LANE, min(((budget - fixed) // per_col) // _LANE * _LANE, 2048))
    m_pad = ((m + tile_m - 1) // tile_m) * tile_m
    return False, tile_m, m_pad // tile_m, m_pad, vmem_limit


# ----------------------------------------------------------------------------
# Kernel A (single-tile fast path): matmul + bias + LeakyReLU + full BatchNorm
# ----------------------------------------------------------------------------
def _fused_block_kernel(w_ref, p_ref, b_ref, g_ref, beta_ref, y_ref, *, inv_m):
    # MXU: (Cout, M) = W(Cout,K) @ P(K,M), f32 accumulation; M is lane-dense.
    z = jnp.dot(w_ref[...], p_ref[...], preferred_element_type=jnp.float32)
    z = z + b_ref[...]                                # (Cout,1) bias broadcast
    z = jnp.where(z >= 0.0, z, _NEG_SLOPE * z)        # LeakyReLU(0.2)
    mean = jnp.sum(z, axis=1, keepdims=True) * inv_m  # XLU reduction
    zc = z - mean
    var = jnp.sum(zc * zc, axis=1, keepdims=True) * inv_m   # centered variance
    scale = g_ref[...] * lax.rsqrt(var + _EPS)               # EUP rsqrt
    y_ref[...] = (zc * scale + beta_ref[...]).astype(y_ref.dtype)


# ----------------------------------------------------------------------------
# Kernel B (multi-tile): matmul + bias + LeakyReLU + BN-stats accumulation
# ----------------------------------------------------------------------------
def _matmul_act_stats_kernel(w_ref, p_ref, b_ref, z_ref, sum_ref, ssq_ref,
                             *, m_true, tile_m, has_pad):
    i = pl.program_id(0)

    @pl.when(i == 0)
    def _():
        sum_ref[...] = jnp.zeros_like(sum_ref)
        ssq_ref[...] = jnp.zeros_like(ssq_ref)

    z = jnp.dot(w_ref[...], p_ref[...], preferred_element_type=jnp.float32)
    z = z + b_ref[...]
    z = jnp.where(z >= 0.0, z, _NEG_SLOPE * z)
    z_ref[...] = z.astype(z_ref.dtype)

    if has_pad:
        last = pl.num_programs(0) - 1

        @pl.when(i < last)                       # full tiles: no lane mask
        def _():
            sum_ref[...] += jnp.sum(z, axis=1, keepdims=True)
            ssq_ref[...] += jnp.sum(z * z, axis=1, keepdims=True)

        @pl.when(i == last)                      # only the last tile is partial
        def _():
            col = i * tile_m + lax.broadcasted_iota(jnp.int32, z.shape, 1)
            zm = jnp.where(col < m_true, z, 0.0)
            sum_ref[...] += jnp.sum(zm, axis=1, keepdims=True)
            ssq_ref[...] += jnp.sum(zm * zm, axis=1, keepdims=True)
    else:
        sum_ref[...] += jnp.sum(z, axis=1, keepdims=True)
        ssq_ref[...] += jnp.sum(z * z, axis=1, keepdims=True)


# ----------------------------------------------------------------------------
# im2col in CNHW layout -> (K, M) patch matrix with no transpose
# ----------------------------------------------------------------------------
def _im2col_cnhw(x_cnhw, kk, st, pd, ho, wo):
    c_in, n = x_cnhw.shape[:2]
    xp = jnp.pad(x_cnhw, ((0, 0), (0, 0), (pd, pd), (pd, pd)))
    strips = [xp[:, :, dh:dh + st * ho:st, dw:dw + st * wo:st]
              for dh in range(kk) for dw in range(kk)]      # each (C,N,Ho,Wo)
    return jnp.stack(strips, axis=1).reshape(c_in * kk * kk, n * ho * wo)


# ----------------------------------------------------------------------------
# One conv block (activations kept in CNHW layout)
# ----------------------------------------------------------------------------
def _conv_block(x_cnhw, w_oihw, b, gamma, beta, matmul_dtype, out_dtype):
    c_in, n, h, wd = x_cnhw.shape
    c_out = w_oihw.shape[0]
    kk, st, pd = 4, 2, 1
    ho = (h + 2 * pd - kk) // st + 1
    wo = (wd + 2 * pd - kk) // st + 1
    m = n * ho * wo
    kdim = c_in * kk * kk

    # TODO(synk): replace this XLA-side gather with in-kernel strided DMAs.
    patches = _im2col_cnhw(x_cnhw, kk, st, pd, ho, wo).astype(matmul_dtype)

    w_mat = w_oihw.reshape(c_out, kdim).astype(matmul_dtype)
    b_col = b.reshape(c_out, 1).astype(jnp.float32)
    g_col = gamma.reshape(c_out, 1).astype(jnp.float32)
    beta_col = beta.reshape(c_out, 1).astype(jnp.float32)

    in_bytes = jnp.dtype(matmul_dtype).itemsize
    out_bytes = jnp.dtype(out_dtype).itemsize
    single, tile_m, n_tiles, m_pad, vmem_limit = _plan_block(
        m, kdim, c_out, in_bytes, out_bytes)

    if single:
        # One launch: conv-as-matmul + bias + LeakyReLU + full BatchNorm.
        y = pl.pallas_call(
            functools.partial(_fused_block_kernel, inv_m=1.0 / m),
            grid=(1,),
            in_specs=[
                pl.BlockSpec((c_out, kdim), lambda i: (0, 0)),   # weights
                pl.BlockSpec((kdim, m), lambda i: (0, 0)),       # patches
                pl.BlockSpec((c_out, 1), lambda i: (0, 0)),      # bias
                pl.BlockSpec((c_out, 1), lambda i: (0, 0)),      # gamma
                pl.BlockSpec((c_out, 1), lambda i: (0, 0)),      # beta
            ],
            out_specs=pl.BlockSpec((c_out, m), lambda i: (0, 0)),
            out_shape=jax.ShapeDtypeStruct((c_out, m), out_dtype),
            compiler_params=pltpu.CompilerParams(
                dimension_semantics=("arbitrary",),
                vmem_limit_bytes=vmem_limit),
        )(w_mat, patches, b_col, g_col, beta_col)
        return y.reshape(c_out, n, ho, wo)

    # Multi-tile path: Pallas does matmul+bias+LeakyReLU+stats; the folded
    # per-channel scale/shift is applied by XLA, fused into the next layer's
    # im2col (or the final flatten) — no standalone elementwise kernel.
    if m_pad != m:
        patches = jnp.pad(patches, ((0, 0), (0, m_pad - m)))

    kernel = functools.partial(_matmul_act_stats_kernel,
                               m_true=m, tile_m=tile_m, has_pad=(m_pad != m))
    z, zsum, zssq = pl.pallas_call(
        kernel,
        grid=(n_tiles,),
        in_specs=[
            pl.BlockSpec((c_out, kdim), lambda i: (0, 0)),       # weights
            pl.BlockSpec((kdim, tile_m), lambda i: (0, i)),      # patch tile
            pl.BlockSpec((c_out, 1), lambda i: (0, 0)),          # bias
        ],
        out_specs=(
            pl.BlockSpec((c_out, tile_m), lambda i: (0, i)),     # activation
            pl.BlockSpec((c_out, 1), lambda i: (0, 0)),          # sum (resident)
            pl.BlockSpec((c_out, 1), lambda i: (0, 0)),          # sumsq (resident)
        ),
        out_shape=(
            jax.ShapeDtypeStruct((c_out, m_pad), out_dtype),
            jax.ShapeDtypeStruct((c_out, 1), jnp.float32),
            jax.ShapeDtypeStruct((c_out, 1), jnp.float32),
        ),
        compiler_params=pltpu.CompilerParams(
            dimension_semantics=("arbitrary",),   # stats accumulate across tiles
            vmem_limit_bytes=vmem_limit),
    )(w_mat, patches, b_col)

    # TODO(synk): for very large M switch to shifted/Welford accumulation to
    # avoid E[z^2]-E[z]^2 cancellation.
    mean = zsum / m
    var = jnp.maximum(zssq / m - mean * mean, 0.0)
    scale = g_col * lax.rsqrt(var + _EPS)
    shift = beta_col - mean * scale
    y = (z[:, :m].astype(jnp.float32) * scale + shift).astype(out_dtype)
    return y.reshape(c_out, n, ho, wo)


# ----------------------------------------------------------------------------
# Encoder: parameter init + forward
# ----------------------------------------------------------------------------
def init_encoder_params(key, nc, nef):
    channels = [nc, nef, nef * 2, nef * 4, nef * 8]
    params = []
    for li in range(4):
        c_in, c_out = channels[li], channels[li + 1]
        key, kw, kb = jax.random.split(key, 3)
        w = 0.05 * jax.random.normal(kw, (c_out, c_in, 4, 4), jnp.float32)  # OIHW
        b = 0.05 * jax.random.normal(kb, (c_out,), jnp.float32)
        gamma = jnp.ones((c_out,), jnp.float32)   # BatchNorm2d weight init
        beta = jnp.zeros((c_out,), jnp.float32)   # BatchNorm2d bias init
        params.append((w, b, gamma, beta))
    return params


def encoder_forward(x_nchw, params, matmul_dtype=jnp.float32):
    """x_nchw: (N, nc, isize, isize) f32 -> (N, nef*8*Hf*Wf)."""
    n = x_nchw.shape[0]
    x = jnp.transpose(x_nchw, (1, 0, 2, 3))       # CNHW (transpose-free im2col)
    bf16_mode = jnp.dtype(matmul_dtype) == jnp.dtype(jnp.bfloat16)
    n_layers = len(params)
    for li, (w, b, gamma, beta) in enumerate(params):
        # Store intermediates in bf16 on the bf16 fast path; final output f32.
        out_dtype = jnp.bfloat16 if (bf16_mode and li + 1 < n_layers) else jnp.float32
        x = _conv_block(x, w, b, gamma, beta, matmul_dtype, out_dtype)
    # PyTorch: hidden.view(batch, -1) on NCHW layout.
    return jnp.transpose(x, (1, 0, 2, 3)).reshape(n, -1)


# ----------------------------------------------------------------------------
# Pure-JAX reference (same operand precision, f32 accumulation)
# ----------------------------------------------------------------------------
def encoder_forward_ref(x_nchw, params, matmul_dtype=jnp.float32):
    x = x_nchw
    for (w, b, gamma, beta) in params:
        y = lax.conv_general_dilated(
            x.astype(matmul_dtype), w.astype(matmul_dtype),
            window_strides=(2, 2), padding=((1, 1), (1, 1)),
            dimension_numbers=("NCHW", "OIHW", "NCHW"),
            preferred_element_type=jnp.float32,
        ) + b.reshape(1, -1, 1, 1)
        y = jnp.where(y >= 0.0, y, _NEG_SLOPE * y)
        mean = jnp.mean(y, axis=(0, 2, 3), keepdims=True)
        var = jnp.mean((y - mean) ** 2, axis=(0, 2, 3), keepdims=True)
        y = (y - mean) * lax.rsqrt(var + _EPS)
        x = y * gamma.reshape(1, -1, 1, 1) + beta.reshape(1, -1, 1, 1)
    return x.reshape(x.shape[0], -1)


if __name__ == "__main__":
    # Small shapes consistent with the module: nc=4, nef=8, isize=16, batch=2.
    batch, nc, nef, isize = 2, 4, 8, 16

    key = jax.random.PRNGKey(0)
    key, kx = jax.random.split(key)
    x = jax.random.normal(kx, (batch, nc, isize, isize), jnp.float32)
    params = init_encoder_params(key, nc, nef)

    fwd_f32 = jax.jit(lambda xx, pp: encoder_forward(xx, pp, jnp.float32))
    fwd_bf16 = jax.jit(lambda xx, pp: encoder_forward(xx, pp, jnp.bfloat16))

    # f32 MXU-operand path (exact module semantics).
    out = jax.block_until_ready(fwd_f32(x, params))
    # Shape check: isize 16 -> 8 -> 4 -> 2 -> 1, channels nef*8 = 64.
    assert out.shape == (batch, nef * 8 * 1 * 1), out.shape
    ref = jax.block_until_ready(encoder_forward_ref(x, params, jnp.float32))
    err = float(jnp.max(jnp.abs(out - ref)))
    assert jnp.allclose(out, ref, rtol=5e-2, atol=5e-2), err

    # bf16 MXU-operand + bf16-stored-intermediate fast path, checked against a
    # reference using the same operand precision (looser tolerance: reduced-
    # precision intermediates can straddle bf16 rounding boundaries).
    out_bf = jax.block_until_ready(fwd_bf16(x, params)).astype(jnp.float32)
    ref_bf = jax.block_until_ready(
        encoder_forward_ref(x, params, jnp.bfloat16)).astype(jnp.float32)
    err_bf = float(jnp.max(jnp.abs(out_bf - ref_bf)))
    assert jnp.allclose(out_bf, ref_bf, rtol=1e-1, atol=1e-1), err_bf

    print("KERNEL_OK")
</pallas_src>

<mosaic_0001>
module attributes {stable_mosaic.version = 11 : i64} {
  func.func @_fused_block_kernel(%arg0: i32, %arg1: memref<8x64xf32, #tpu.memory_space<vmem>>, %arg2: memref<64x128xf32, #tpu.memory_space<vmem>>, %arg3: memref<8x1xf32, #tpu.memory_space<vmem>>, %arg4: memref<8x1xf32, #tpu.memory_space<vmem>>, %arg5: memref<8x1xf32, #tpu.memory_space<vmem>>, %arg6: memref<8x128xf32, #tpu.memory_space<vmem>>) attributes {dimension_semantics = [#tpu.dimension_semantics<arbitrary>], iteration_bounds = array<i64: 1>, scalar_prefetch = 0 : i64, scratch_operands = 0 : i64, tpu.core_type = #tpu.core_type<tc>, window_params = [{pipeline_mode = #tpu.pipeline_mode<synchronous>, transform_indices = @transform_0, window_bounds = array<i64: 8, 64>}, {pipeline_mode = #tpu.pipeline_mode<synchronous>, transform_indices = @transform_1, window_bounds = array<i64: 64, 128>}, {pipeline_mode = #tpu.pipeline_mode<synchronous>, transform_indices = @transform_2, window_bounds = array<i64: 8, 1>}, {pipeline_mode = #tpu.pipeline_mode<synchronous>, transform_indices = @transform_3, window_bounds = array<i64: 8, 1>}, {pipeline_mode = #tpu.pipeline_mode<synchronous>, transform_indices = @transform_4, window_bounds = array<i64: 8, 1>}, {pipeline_mode = #tpu.pipeline_mode<synchronous>, transform_indices = @transform_5, window_bounds = array<i64: 8, 128>}]} {
    %c0 = arith.constant 0 : index
    %c0_0 = arith.constant 0 : index
    %0 = vector.load %arg1[%c0, %c0_0] : memref<8x64xf32, #tpu.memory_space<vmem>>, vector<8x64xf32>
    %c0_1 = arith.constant 0 : index
    %c0_2 = arith.constant 0 : index
    %1 = vector.load %arg2[%c0_1, %c0_2] : memref<64x128xf32, #tpu.memory_space<vmem>>, vector<64x128xf32>
    %cst = arith.constant dense<0.000000e+00> : vector<8x128xf32>
    %2 = tpu.matmul %0, %1, %cst {dimension_numbers = #tpu.dot_dimension_numbers<[1], [0], [0], [1], [0, 0, 1, 1], [], []>} : vector<8x64xf32>, vector<64x128xf32>, vector<8x128xf32> -> vector<8x128xf32>
    %c0_3 = arith.constant 0 : index
    %c0_4 = arith.constant 0 : index
    %3 = vector.load %arg3[%c0_3, %c0_4] : memref<8x1xf32, #tpu.memory_space<vmem>>, vector<8x1xf32>
    %4 = vector.broadcast %3 : vector<8x1xf32> to vector<8x128xf32>
    %5 = arith.addf %2, %4 : vector<8x128xf32>
    %cst_5 = arith.constant 0.000000e+00 : f32
    %6 = vector.broadcast %cst_5 : f32 to vector<8x128xf32>
    %7 = arith.cmpf oge, %5, %6 : vector<8x128xf32>
    %cst_6 = arith.constant 2.000000e-01 : f32
    %8 = vector.broadcast %cst_6 : f32 to vector<8x128xf32>
    %9 = arith.mulf %8, %5 : vector<8x128xf32>
    %10 = arith.select %7, %5, %9 : vector<8x128xi1>, vector<8x128xf32>
    %cst_7 = arith.constant dense<0.000000e+00> : vector<8xf32>
    %11 = vector.multi_reduction <add>, %10, %cst_7 [1] : vector<8x128xf32> to vector<8xf32>
    %12 = vector.shape_cast %11 : vector<8xf32> to vector<8x1xf32>
    %cst_8 = arith.constant 7.812500e-03 : f32
    %13 = vector.broadcast %cst_8 : f32 to vector<8x1xf32>
    %14 = arith.mulf %12, %13 : vector<8x1xf32>
    %15 = vector.broadcast %14 : vector<8x1xf32> to vector<8x128xf32>
    %16 = arith.subf %10, %15 : vector<8x128xf32>
    %17 = arith.mulf %16, %16 : vector<8x128xf32>
    %cst_9 = arith.constant dense<0.000000e+00> : vector<8xf32>
    %18 = vector.multi_reduction <add>, %17, %cst_9 [1] : vector<8x128xf32> to vector<8xf32>
    %19 = vector.shape_cast %18 : vector<8xf32> to vector<8x1xf32>
    %cst_10 = arith.constant 7.812500e-03 : f32
    %20 = vector.broadcast %cst_10 : f32 to vector<8x1xf32>
    %21 = arith.mulf %19, %20 : vector<8x1xf32>
    %c0_11 = arith.constant 0 : index
    %c0_12 = arith.constant 0 : index
    %22 = vector.load %arg4[%c0_11, %c0_12] : memref<8x1xf32, #tpu.memory_space<vmem>>, vector<8x1xf32>
    %cst_13 = arith.constant 9.99999974E-6 : f32
    %23 = vector.broadcast %cst_13 : f32 to vector<8x1xf32>
    %24 = arith.addf %21, %23 : vector<8x1xf32>
    %25 = math.rsqrt %24 : vector<8x1xf32>
    %26 = arith.mulf %22, %25 : vector<8x1xf32>
    %27 = vector.broadcast %26 : vector<8x1xf32> to vector<8x128xf32>
    %28 = arith.mulf %16, %27 : vector<8x128xf32>
    %c0_14 = arith.constant 0 : index
    %c0_15 = arith.constant 0 : index
    %29 = vector.load %arg5[%c0_14, %c0_15] : memref<8x1xf32, #tpu.memory_space<vmem>>, vector<8x1xf32>
    %30 = vector.broadcast %29 : vector<8x1xf32> to vector<8x128xf32>
    %31 = arith.addf %28, %30 : vector<8x128xf32>
    %c0_16 = arith.constant 0 : index
    %c0_17 = arith.constant 0 : index
    %32 = vector.load %arg6[%c0_16, %c0_17] : memref<8x128xf32, #tpu.memory_space<vmem>>, vector<8x128xf32>
    tpu.vector_store %arg6[%c0_16, %c0_17], %31 {strides = array<i32>} : memref<8x128xf32, #tpu.memory_space<vmem>>, vector<8x128xf32>,
    return
  }
  func.func @transform_0(%arg0: i32) -> (i32, i32) {
    %c0_i32 = arith.constant 0 : i32
    %c0_i32_0 = arith.constant 0 : i32
    %c0_i32_1 = arith.constant 0 : i32
    return %c0_i32, %c0_i32_0 : i32, i32
  }
  func.func @transform_1(%arg0: i32) -> (i32, i32) {
    %c0_i32 = arith.constant 0 : i32
    %c0_i32_0 = arith.constant 0 : i32
    %c0_i32_1 = arith.constant 0 : i32
    return %c0_i32, %c0_i32_0 : i32, i32
  }
  func.func @transform_2(%arg0: i32) -> (i32, i32) {
    %c0_i32 = arith.constant 0 : i32
    %c0_i32_0 = arith.constant 0 : i32
    %c0_i32_1 = arith.constant 0 : i32
    return %c0_i32, %c0_i32_0 : i32, i32
  }
  func.func @transform_3(%arg0: i32) -> (i32, i32) {
    %c0_i32 = arith.constant 0 : i32
    %c0_i32_0 = arith.constant 0 : i32
    %c0_i32_1 = arith.constant 0 : i32
    return %c0_i32, %c0_i32_0 : i32, i32
  }
  func.func @transform_4(%arg0: i32) -> (i32, i32) {
    %c0_i32 = arith.constant 0 : i32
    %c0_i32_0 = arith.constant 0 : i32
    %c0_i32_1 = arith.constant 0 : i32
    return %c0_i32, %c0_i32_0 : i32, i32
  }
  func.func @transform_5(%arg0: i32) -> (i32, i32) {
    %c0_i32 = arith.constant 0 : i32
    %c0_i32_0 = arith.constant 0 : i32
    %c0_i32_1 = arith.constant 0 : i32
    return %c0_i32, %c0_i32_0 : i32, i32
  }
}

module attributes {stable_mosaic.version = 11 : i64} {
  func.func @_fused_block_kernel(%arg0: i32, %arg1: memref<16x128xf32, #tpu.memory_space<vmem>>, %arg2: memref<128x32xf32, #tpu.memory_space<vmem>>, %arg3: memref<16x1xf32, #tpu.memory_space<vmem>>, %arg4: memref<16x1xf32, #tpu.memory_space<vmem>>, %arg5: memref<16x1xf32, #tpu.memory_space<vmem>>, %arg6: memref<16x32xf32, #tpu.memory_space<vmem>>) attributes {dimension_semantics = [#tpu.dimension_semantics<arbitrary>], iteration_bounds = array<i64: 1>, scalar_prefetch = 0 : i64, scratch_operands = 0 : i64, tpu.core_type = #tpu.core_type<tc>, window_params = [{pipeline_mode = #tpu.pipeline_mode<synchronous>, transform_indices = @transform_0, window_bounds = array<i64: 16, 128>}, {pipeline_mode = #tpu.pipeline_mode<synchronous>, transform_indices = @transform_1, window_bounds = array<i64: 128, 32>}, {pipeline_mode = #tpu.pipeline_mode<synchronous>, transform_indices = @transform_2, window_bounds = array<i64: 16, 1>}, {pipeline_mode = #tpu.pipeline_mode<synchronous>, transform_indices = @transform_3, window_bounds = array<i64: 16, 1>}, {pipeline_mode = #tpu.pipeline_mode<synchronous>, transform_indices = @transform_4, window_bounds = array<i64: 16, 1>}, {pipeline_mode = #tpu.pipeline_mode<synchronous>, transform_indices = @transform_5, window_bounds = array<i64: 16, 32>}]} {
    %c0 = arith.constant 0 : index
    %c0_0 = arith.constant 0 : index
    %0 = vector.load %arg1[%c0, %c0_0] : memref<16x128xf32, #tpu.memory_space<vmem>>, vector<16x128xf32>
    %c0_1 = arith.constant 0 : index
    %c0_2 = arith.constant 0 : index
    %1 = vector.load %arg2[%c0_1, %c0_2] : memref<128x32xf32, #tpu.memory_space<vmem>>, vector<128x32xf32>
    %cst = arith.constant dense<0.000000e+00> : vector<16x32xf32>
    %2 = tpu.matmul %0, %1, %cst {dimension_numbers = #tpu.dot_dimension_numbers<[1], [0], [0], [1], [0, 0, 1, 1], [], []>} : vector<16x128xf32>, vector<128x32xf32>, vector<16x32xf32> -> vector<16x32xf32>
    %c0_3 = arith.constant 0 : index
    %c0_4 = arith.constant 0 : index
    %3 = vector.load %arg3[%c0_3, %c0_4] : memref<16x1xf32, #tpu.memory_space<vmem>>, vector<16x1xf32>
    %4 = vector.broadcast %3 : vector<16x1xf32> to vector<16x32xf32>
    %5 = arith.addf %2, %4 : vector<16x32xf32>
    %cst_5 = arith.constant 0.000000e+00 : f32
    %6 = vector.broadcast %cst_5 : f32 to vector<16x32xf32>
    %7 = arith.cmpf oge, %5, %6 : vector<16x32xf32>
    %cst_6 = arith.constant 2.000000e-01 : f32
    %8 = vector.broadcast %cst_6 : f32 to vector<16x32xf32>
    %9 = arith.mulf %8, %5 : vector<16x32xf32>
    %10 = arith.select %7, %5, %9 : vector<16x32xi1>, vector<16x32xf32>
    %cst_7 = arith.constant dense<0.000000e+00> : vector<16xf32>
    %11 = vector.multi_reduction <add>, %10, %cst_7 [1] : vector<16x32xf32> to vector<16xf32>
    %12 = vector.shape_cast %11 : vector<16xf32> to vector<16x1xf32>
    %cst_8 = arith.constant 3.125000e-02 : f32
    %13 = vector.broadcast %cst_8 : f32 to vector<16x1xf32>
    %14 = arith.mulf %12, %13 : vector<16x1xf32>
    %15 = vector.broadcast %14 : vector<16x1xf32> to vector<16x32xf32>
    %16 = arith.subf %10, %15 : vector<16x32xf32>
    %17 = arith.mulf %16, %16 : vector<16x32xf32>
    %cst_9 = arith.constant dense<0.000000e+00> : vector<16xf32>
    %18 = vector.multi_reduction <add>, %17, %cst_9 [1] : vector<16x32xf32> to vector<16xf32>
    %19 = vector.shape_cast %18 : vector<16xf32> to vector<16x1xf32>
    %cst_10 = arith.constant 3.125000e-02 : f32
    %20 = vector.broadcast %cst_10 : f32 to vector<16x1xf32>
    %21 = arith.mulf %19, %20 : vector<16x1xf32>
    %c0_11 = arith.constant 0 : index
    %c0_12 = arith.constant 0 : index
    %22 = vector.load %arg4[%c0_11, %c0_12] : memref<16x1xf32, #tpu.memory_space<vmem>>, vector<16x1xf32>
    %cst_13 = arith.constant 9.99999974E-6 : f32
    %23 = vector.broadcast %cst_13 : f32 to vector<16x1xf32>
    %24 = arith.addf %21, %23 : vector<16x1xf32>
    %25 = math.rsqrt %24 : vector<16x1xf32>
    %26 = arith.mulf %22, %25 : vector<16x1xf32>
    %27 = vector.broadcast %26 : vector<16x1xf32> to vector<16x32xf32>
    %28 = arith.mulf %16, %27 : vector<16x32xf32>
    %c0_14 = arith.constant 0 : index
    %c0_15 = arith.constant 0 : index
    %29 = vector.load %arg5[%c0_14, %c0_15] : memref<16x1xf32, #tpu.memory_space<vmem>>, vector<16x1xf32>
    %30 = vector.broadcast %29 : vector<16x1xf32> to vector<16x32xf32>
    %31 = arith.addf %28, %30 : vector<16x32xf32>
    %c0_16 = arith.constant 0 : index
    %c0_17 = arith.constant 0 : index
    %32 = vector.load %arg6[%c0_16, %c0_17] : memref<16x32xf32, #tpu.memory_space<vmem>>, vector<16x32xf32>
    tpu.vector_store %arg6[%c0_16, %c0_17], %31 {strides = array<i32>} : memref<16x32xf32, #tpu.memory_space<vmem>>, vector<16x32xf32>,
    return
  }
  func.func @transform_0(%arg0: i32) -> (i32, i32) {
    %c0_i32 = arith.constant 0 : i32
    %c0_i32_0 = arith.constant 0 : i32
    %c0_i32_1 = arith.constant 0 : i32
    return %c0_i32, %c0_i32_0 : i32, i32
  }
  func.func @transform_1(%arg0: i32) -> (i32, i32) {
    %c0_i32 = arith.constant 0 : i32
    %c0_i32_0 = arith.constant 0 : i32
    %c0_i32_1 = arith.constant 0 : i32
    return %c0_i32, %c0_i32_0 : i32, i32
  }
  func.func @transform_2(%arg0: i32) -> (i32, i32) {
    %c0_i32 = arith.constant 0 : i32
    %c0_i32_0 = arith.constant 0 : i32
    %c0_i32_1 = arith.constant 0 : i32
    return %c0_i32, %c0_i32_0 : i32, i32
  }
  func.func @transform_3(%arg0: i32) -> (i32, i32) {
    %c0_i32 = arith.constant 0 : i32
    %c0_i32_0 = arith.constant 0 : i32
    %c0_i32_1 = arith.constant 0 : i32
    return %c0_i32, %c0_i32_0 : i32, i32
  }
  func.func @transform_4(%arg0: i32) -> (i32, i32) {
    %c0_i32 = arith.constant 0 : i32
    %c0_i32_0 = arith.constant 0 : i32
    %c0_i32_1 = arith.constant 0 : i32
    return %c0_i32, %c0_i32_0 : i32, i32
  }
  func.func @transform_5(%arg0: i32) -> (i32, i32) {
    %c0_i32 = arith.constant 0 : i32
    %c0_i32_0 = arith.constant 0 : i32
    %c0_i32_1 = arith.constant 0 : i32
    return %c0_i32, %c0_i32_0 : i32, i32
  }
}

module attributes {stable_mosaic.version = 11 : i64} {
  func.func @_fused_block_kernel(%arg0: i32, %arg1: memref<32x256xf32, #tpu.memory_space<vmem>>, %arg2: memref<256x8xf32, #tpu.memory_space<vmem>>, %arg3: memref<32x1xf32, #tpu.memory_space<vmem>>, %arg4: memref<32x1xf32, #tpu.memory_space<vmem>>, %arg5: memref<32x1xf32, #tpu.memory_space<vmem>>, %arg6: memref<32x8xf32, #tpu.memory_space<vmem>>) attributes {dimension_semantics = [#tpu.dimension_semantics<arbitrary>], iteration_bounds = array<i64: 1>, scalar_prefetch = 0 : i64, scratch_operands = 0 : i64, tpu.core_type = #tpu.core_type<tc>, window_params = [{pipeline_mode = #tpu.pipeline_mode<synchronous>, transform_indices = @transform_0, window_bounds = array<i64: 32, 256>}, {pipeline_mode = #tpu.pipeline_mode<synchronous>, transform_indices = @transform_1, window_bounds = array<i64: 256, 8>}, {pipeline_mode = #tpu.pipeline_mode<synchronous>, transform_indices = @transform_2, window_bounds = array<i64: 32, 1>}, {pipeline_mode = #tpu.pipeline_mode<synchronous>, transform_indices = @transform_3, window_bounds = array<i64: 32, 1>}, {pipeline_mode = #tpu.pipeline_mode<synchronous>, transform_indices = @transform_4, window_bounds = array<i64: 32, 1>}, {pipeline_mode = #tpu.pipeline_mode<synchronous>, transform_indices = @transform_5, window_bounds = array<i64: 32, 8>}]} {
    %c0 = arith.constant 0 : index
    %c0_0 = arith.constant 0 : index
    %0 = vector.load %arg1[%c0, %c0_0] : memref<32x256xf32, #tpu.memory_space<vmem>>, vector<32x256xf32>
    %c0_1 = arith.constant 0 : index
    %c0_2 = arith.constant 0 : index
    %1 = vector.load %arg2[%c0_1, %c0_2] : memref<256x8xf32, #tpu.memory_space<vmem>>, vector<256x8xf32>
    %cst = arith.constant dense<0.000000e+00> : vector<32x8xf32>
    %2 = tpu.matmul %0, %1, %cst {dimension_numbers = #tpu.dot_dimension_numbers<[1], [0], [0], [1], [0, 0, 1, 1], [], []>} : vector<32x256xf32>, vector<256x8xf32>, vector<32x8xf32> -> vector<32x8xf32>
    %c0_3 = arith.constant 0 : index
    %c0_4 = arith.constant 0 : index
    %3 = vector.load %arg3[%c0_3, %c0_4] : memref<32x1xf32, #tpu.memory_space<vmem>>, vector<32x1xf32>
    %4 = vector.broadcast %3 : vector<32x1xf32> to vector<32x8xf32>
    %5 = arith.addf %2, %4 : vector<32x8xf32>
    %cst_5 = arith.constant 0.000000e+00 : f32
    %6 = vector.broadcast %cst_5 : f32 to vector<32x8xf32>
    %7 = arith.cmpf oge, %5, %6 : vector<32x8xf32>
    %cst_6 = arith.constant 2.000000e-01 : f32
    %8 = vector.broadcast %cst_6 : f32 to vector<32x8xf32>
    %9 = arith.mulf %8, %5 : vector<32x8xf32>
    %10 = arith.select %7, %5, %9 : vector<32x8xi1>, vector<32x8xf32>
    %cst_7 = arith.constant dense<0.000000e+00> : vector<32xf32>
    %11 = vector.multi_reduction <add>, %10, %cst_7 [1] : vector<32x8xf32> to vector<32xf32>
    %12 = vector.shape_cast %11 : vector<32xf32> to vector<32x1xf32>
    %cst_8 = arith.constant 1.250000e-01 : f32
    %13 = vector.broadcast %cst_8 : f32 to vector<32x1xf32>
    %14 = arith.mulf %12, %13 : vector<32x1xf32>
    %15 = vector.broadcast %14 : vector<32x1xf32> to vector<32x8xf32>
    %16 = arith.subf %10, %15 : vector<32x8xf32>
    %17 = arith.mulf %16, %16 : vector<32x8xf32>
    %cst_9 = arith.constant dense<0.000000e+00> : vector<32xf32>
    %18 = vector.multi_reduction <add>, %17, %cst_9 [1] : vector<32x8xf32> to vector<32xf32>
    %19 = vector.shape_cast %18 : vector<32xf32> to vector<32x1xf32>
    %cst_10 = arith.constant 1.250000e-01 : f32
    %20 = vector.broadcast %cst_10 : f32 to vector<32x1xf32>
    %21 = arith.mulf %19, %20 : vector<32x1xf32>
    %c0_11 = arith.constant 0 : index
    %c0_12 = arith.constant 0 : index
    %22 = vector.load %arg4[%c0_11, %c0_12] : memref<32x1xf32, #tpu.memory_space<vmem>>, vector<32x1xf32>
    %cst_13 = arith.constant 9.99999974E-6 : f32
    %23 = vector.broadcast %cst_13 : f32 to vector<32x1xf32>
    %24 = arith.addf %21, %23 : vector<32x1xf32>
    %25 = math.rsqrt %24 : vector<32x1xf32>
    %26 = arith.mulf %22, %25 : vector<32x1xf32>
    %27 = vector.broadcast %26 : vector<32x1xf32> to vector<32x8xf32>
    %28 = arith.mulf %16, %27 : vector<32x8xf32>
    %c0_14 = arith.constant 0 : index
    %c0_15 = arith.constant 0 : index
    %29 = vector.load %arg5[%c0_14, %c0_15] : memref<32x1xf32, #tpu.memory_space<vmem>>, vector<32x1xf32>
    %30 = vector.broadcast %29 : vector<32x1xf32> to vector<32x8xf32>
    %31 = arith.addf %28, %30 : vector<32x8xf32>
    %c0_16 = arith.constant 0 : index
    %c0_17 = arith.constant 0 : index
    %32 = vector.load %arg6[%c0_16, %c0_17] : memref<32x8xf32, #tpu.memory_space<vmem>>, vector<32x8xf32>
    tpu.vector_store %arg6[%c0_16, %c0_17], %31 {strides = array<i32>} : memref<32x8xf32, #tpu.memory_space<vmem>>, vector<32x8xf32>,
    return
  }
  func.func @transform_0(%arg0: i32) -> (i32, i32) {
    %c0_i32 = arith.constant 0 : i32
    %c0_i32_0 = arith.constant 0 : i32
    %c0_i32_1 = arith.constant 0 : i32
    return %c0_i32, %c0_i32_0 : i32, i32
  }
  func.func @transform_1(%arg0: i32) -> (i32, i32) {
    %c0_i32 = arith.constant 0 : i32
    %c0_i32_0 = arith.constant 0 : i32
    %c0_i32_1 = arith.constant 0 : i32
    return %c0_i32, %c0_i32_0 : i32, i32
  }
  func.func @transform_2(%arg0: i32) -> (i32, i32) {
    %c0_i32 = arith.constant 0 : i32
    %c0_i32_0 = arith.constant 0 : i32
    %c0_i32_1 = arith.constant 0 : i32
    return %c0_i32, %c0_i32_0 : i32, i32
  }
  func.func @transform_3(%arg0: i32) -> (i32, i32) {
    %c0_i32 = arith.constant 0 : i32
    %c0_i32_0 = arith.constant 0 : i32
    %c0_i32_1 = arith.constant 0 : i32
    return %c0_i32, %c0_i32_0 : i32, i32
  }
  func.func @transform_4(%arg0: i32) -> (i32, i32) {
    %c0_i32 = arith.constant 0 : i32
    %c0_i32_0 = arith.constant 0 : i32
    %c0_i32_1 = arith.constant 0 : i32
    return %c0_i32, %c0_i32_0 : i32, i32
  }
  func.func @transform_5(%arg0: i32) -> (i32, i32) {
    %c0_i32 = arith.constant 0 : i32
    %c0_i32_0 = arith.constant 0 : i32
    %c0_i32_1 = arith.constant 0 : i32
    return %c0_i32, %c0_i32_0 : i32, i32
  }
}

module attributes {stable_mosaic.version = 11 : i64} {
  func.func @_fused_block_kernel(%arg0: i32, %arg1: memref<64x512xf32, #tpu.memory_space<vmem>>, %arg2: memref<512x2xf32, #tpu.memory_space<vmem>>, %arg3: memref<64x1xf32, #tpu.memory_space<vmem>>, %arg4: memref<64x1xf32, #tpu.memory_space<vmem>>, %arg5: memref<64x1xf32, #tpu.memory_space<vmem>>, %arg6: memref<64x2xf32, #tpu.memory_space<vmem>>) attributes {dimension_semantics = [#tpu.dimension_semantics<arbitrary>], iteration_bounds = array<i64: 1>, scalar_prefetch = 0 : i64, scratch_operands = 0 : i64, tpu.core_type = #tpu.core_type<tc>, window_params = [{pipeline_mode = #tpu.pipeline_mode<synchronous>, transform_indices = @transform_0, window_bounds = array<i64: 64, 512>}, {pipeline_mode = #tpu.pipeline_mode<synchronous>, transform_indices = @transform_1, window_bounds = array<i64: 512, 2>}, {pipeline_mode = #tpu.pipeline_mode<synchronous>, transform_indices = @transform_2, window_bounds = array<i64: 64, 1>}, {pipeline_mode = #tpu.pipeline_mode<synchronous>, transform_indices = @transform_3, window_bounds = array<i64: 64, 1>}, {pipeline_mode = #tpu.pipeline_mode<synchronous>, transform_indices = @transform_4, window_bounds = array<i64: 64, 1>}, {pipeline_mode = #tpu.pipeline_mode<synchronous>, transform_indices = @transform_5, window_bounds = array<i64: 64, 2>}]} {
    %c0 = arith.constant 0 : index
    %c0_0 = arith.constant 0 : index
    %0 = vector.load %arg1[%c0, %c0_0] : memref<64x512xf32, #tpu.memory_space<vmem>>, vector<64x512xf32>
    %c0_1 = arith.constant 0 : index
    %c0_2 = arith.constant 0 : index
    %1 = vector.load %arg2[%c0_1, %c0_2] : memref<512x2xf32, #tpu.memory_space<vmem>>, vector<512x2xf32>
    %cst = arith.constant dense<0.000000e+00> : vector<64x2xf32>
    %2 = tpu.matmul %0, %1, %cst {dimension_numbers = #tpu.dot_dimension_numbers<[1], [0], [0], [1], [0, 0, 1, 1], [], []>} : vector<64x512xf32>, vector<512x2xf32>, vector<64x2xf32> -> vector<64x2xf32>
    %c0_3 = arith.constant 0 : index
    %c0_4 = arith.constant 0 : index
    %3 = vector.load %arg3[%c0_3, %c0_4] : memref<64x1xf32, #tpu.memory_space<vmem>>, vector<64x1xf32>
    %4 = vector.broadcast %3 : vector<64x1xf32> to vector<64x2xf32>
    %5 = arith.addf %2, %4 : vector<64x2xf32>
    %cst_5 = arith.constant 0.000000e+00 : f32
    %6 = vector.broadcast %cst_5 : f32 to vector<64x2xf32>
    %7 = arith.cmpf oge, %5, %6 : vector<64x2xf32>
    %cst_6 = arith.constant 2.000000e-01 : f32
    %8 = vector.broadcast %cst_6 : f32 to vector<64x2xf32>
    %9 = arith.mulf %8, %5 : vector<64x2xf32>
    %10 = arith.select %7, %5, %9 : vector<64x2xi1>, vector<64x2xf32>
    %cst_7 = arith.constant dense<0.000000e+00> : vector<64xf32>
    %11 = vector.multi_reduction <add>, %10, %cst_7 [1] : vector<64x2xf32> to vector<64xf32>
    %12 = vector.shape_cast %11 : vector<64xf32> to vector<64x1xf32>
    %cst_8 = arith.constant 5.000000e-01 : f32
    %13 = vector.broadcast %cst_8 : f32 to vector<64x1xf32>
    %14 = arith.mulf %12, %13 : vector<64x1xf32>
    %15 = vector.broadcast %14 : vector<64x1xf32> to vector<64x2xf32>
    %16 = arith.subf %10, %15 : vector<64x2xf32>
    %17 = arith.mulf %16, %16 : vector<64x2xf32>
    %cst_9 = arith.constant dense<0.000000e+00> : vector<64xf32>
    %18 = vector.multi_reduction <add>, %17, %cst_9 [1] : vector<64x2xf32> to vector<64xf32>
    %19 = vector.shape_cast %18 : vector<64xf32> to vector<64x1xf32>
    %cst_10 = arith.constant 5.000000e-01 : f32
    %20 = vector.broadcast %cst_10 : f32 to vector<64x1xf32>
    %21 = arith.mulf %19, %20 : vector<64x1xf32>
    %c0_11 = arith.constant 0 : index
    %c0_12 = arith.constant 0 : index
    %22 = vector.load %arg4[%c0_11, %c0_12] : memref<64x1xf32, #tpu.memory_space<vmem>>, vector<64x1xf32>
    %cst_13 = arith.constant 9.99999974E-6 : f32
    %23 = vector.broadcast %cst_13 : f32 to vector<64x1xf32>
    %24 = arith.addf %21, %23 : vector<64x1xf32>
    %25 = math.rsqrt %24 : vector<64x1xf32>
    %26 = arith.mulf %22, %25 : vector<64x1xf32>
    %27 = vector.broadcast %26 : vector<64x1xf32> to vector<64x2xf32>
    %28 = arith.mulf %16, %27 : vector<64x2xf32>
    %c0_14 = arith.constant 0 : index
    %c0_15 = arith.constant 0 : index
    %29 = vector.load %arg5[%c0_14, %c0_15] : memref<64x1xf32, #tpu.memory_space<vmem>>, vector<64x1xf32>
    %30 = vector.broadcast %29 : vector<64x1xf32> to vector<64x2xf32>
    %31 = arith.addf %28, %30 : vector<64x2xf32>
    %c0_16 = arith.constant 0 : index
    %c0_17 = arith.constant 0 : index
    %32 = vector.load %arg6[%c0_16, %c0_17] : memref<64x2xf32, #tpu.memory_space<vmem>>, vector<64x2xf32>
    tpu.vector_store %arg6[%c0_16, %c0_17], %31 {strides = array<i32>} : memref<64x2xf32, #tpu.memory_space<vmem>>, vector<64x2xf32>,
    return
  }
  func.func @transform_0(%arg0: i32) -> (i32, i32) {
    %c0_i32 = arith.constant 0 : i32
    %c0_i32_0 = arith.constant 0 : i32
    %c0_i32_1 = arith.constant 0 : i32
    return %c0_i32, %c0_i32_0 : i32, i32
  }
  func.func @transform_1(%arg0: i32) -> (i32, i32) {
    %c0_i32 = arith.constant 0 : i32
    %c0_i32_0 = arith.constant 0 : i32
    %c0_i32_1 = arith.constant 0 : i32
    return %c0_i32, %c0_i32_0 : i32, i32
  }
  func.func @transform_2(%arg0: i32) -> (i32, i32) {
    %c0_i32 = arith.constant 0 : i32
    %c0_i32_0 = arith.constant 0 : i32
    %c0_i32_1 = arith.constant 0 : i32
    return %c0_i32, %c0_i32_0 : i32, i32
  }
  func.func @transform_3(%arg0: i32) -> (i32, i32) {
    %c0_i32 = arith.constant 0 : i32
    %c0_i32_0 = arith.constant 0 : i32
    %c0_i32_1 = arith.constant 0 : i32
    return %c0_i32, %c0_i32_0 : i32, i32
  }
  func.func @transform_4(%arg0: i32) -> (i32, i32) {
    %c0_i32 = arith.constant 0 : i32
    %c0_i32_0 = arith.constant 0 : i32
    %c0_i32_1 = arith.constant 0 : i32
    return %c0_i32, %c0_i32_0 : i32, i32
  }
  func.func @transform_5(%arg0: i32) -> (i32, i32) {
    %c0_i32 = arith.constant 0 : i32
    %c0_i32_0 = arith.constant 0 : i32
    %c0_i32_1 = arith.constant 0 : i32
    return %c0_i32, %c0_i32_0 : i32, i32
  }
}

</mosaic_0001>

<bundles_post_ra>
// kernel: _lambda_.4
= control target key start
LH: loop header
LB: loop body
LE: loop exit
PB: predicated region body
PF: predicated region fallthrough
CT: control target
= control target key end

     0   :  { %v108_v2 = vmov 0   ;;  %vm35_vm0 = vcmask 523264   ;;  %s178_s1 = inlined_call_operand.vmem [shape: f32[64,128], index: 1, kind: input, shape index: {}]   ;;  %s179_s2 = inlined_call_operand.vmem [shape: f32[8,1], index: 2, kind: input, shape index: {}]   ;;  %s180_s0 = inlined_call_operand.vmem [shape: f32[8,64], index: 0, kind: input, shape index: {}]   ;;  %s181_s4 = inlined_call_operand.vmem [shape: f32[8,1], index: 4, kind: input, shape index: {}]   ;;  %s182_s3 = inlined_call_operand.vmem [shape: f32[8,1], index: 3, kind: input, shape index: {}]   ;;  %s183_s5 = inlined_call_operand.vmem [shape: f32[8,128], index: 5, kind: output, shape index: {}]  }
   0x1   :  { %v28_v0 = vld [vmem:[%s178_s1 + $0x38] sm:$0xff]  ;;  %v27_v1 = vld [vmem:[%s178_s1 + $0x30] sm:$0xff]  ;;  %103 = vset.pattern.permute.xlu0 %v108_v2  ;;  %104 = vset.pattern.permute.xlu1 %v108_v2  ;;  %v26_v3 = vld [vmem:[%s178_s1 + $0x28] sm:$0xff] }
   0x2   :  { %47 = vmatpush.msra.mxu0 %v28_v0  ;;  %105 = vset.pattern.permute.xlu2 %v108_v2  ;;  %v29_v4 = vld [vmem:[%s179_s2] sm:$0xff]  ;;  %v24_v6 = vld [vmem:[%s178_s1 + $0x18] sm:$0xff]  ;;  %v23_v7 = vld [vmem:[%s178_s1 + $0x10] sm:$0xff] }
   0x3   :  { %v25_v5 = vld [vmem:[%s178_s1 + $0x20] sm:$0xff]  ;;  %32 = vperm.xlu0 %103, %v29_v4   ;;  %v22_v8 = vld [vmem:[%s178_s1 + $0x8] sm:$0xff] }
   0x4   :  { %48 = vmatpush.msra.mxu0 %v27_v1  ;;  %v21_v9 = vld [vmem:[%s178_s1] sm:$0xff] }
   0x5   :  { %v20_v10 = vld [vmem:[%s180_s0] sm:$0xff] }
   0x6   :  { %49 = vmatpush.msra.mxu0 %v26_v3  ;;  %v89_v20 = vld [vmem:[%s181_s4] sm:$0xff] }
   0x7   :  { %92 = vperm.xlu2 %105, %v89_v20   ;;  %v70_v29 = vld [vmem:[%s182_s3] sm:$0xff] }
   0x8   :  { %50 = vmatpush.msra.mxu0 %v25_v5 }
   0xa   :  { %51 = vmatpush.msra.mxu0 %v24_v6 }
   0xc   :  { %52 = vmatpush.msra.mxu0 %v23_v7 }
   0xe   :  { %53 = vmatpush.msra.mxu0 %v22_v8 }
  0x10   :  { %54 = vmatpush.msra.mxu0 %v21_v9 }
  0x11   :  { %101 = vmatmul.msk.f32.vlgmr.msra.gmra.mxu0 %vm35_vm0, %v20_v10 }
  0x61   :  { %v93_v34 = vpop.permute.xlu2 %92 }
  0x75   :  { %v33_v11 = vpop.permute.xlu0 %32 }
  0x8e   :  { %v56_v12 = vpop.f32.mrf.mxu0 }
  0x8f   :  { %v57_v13 = vadd.f32 %v56_v12, %v33_v11 }
  0x91   :  { %vm59_vm1 = vcmp.ge.f32.partialorder %v57_v13, 0.0  ;;  %v60_v14 = vmul.f32 0.2, %v57_v13 }
  0x93   :  { %v61_v15 = vsel %vm59_vm1, %v57_v13, %v60_v14 }
  0x94   :  { %62 = vadd.xlane.f32.xlu0 %v61_v15 }
 0x107   :  { %v63_v16 = vpop.xlane.xlu0 %62 }
 0x108   :  { %v64_v17 = vmul.f32 0.0078125, %v63_v16 }
 0x10a   :  { %v65_v18 = vsub.f32 %v61_v15, %v64_v17 }
 0x10c   :  { %v66_v19 = vmul.f32 %v65_v18, %v65_v18 }
 0x10e   :  { %67 = vadd.xlane.f32.xlu1 %v66_v19 }
 0x181   :  { %v68_v21 = vpop.xlane.xlu1 %67 }
 0x182   :  { %v69_v22 = vmul.f32 0.0078125, %v68_v21 }
 0x184   :  { %v71_v23 = vadd.f32 1e-05, %v69_v22 }
 0x186   :  { %106 = vrsqrt.f32 %v71_v23  ;;  %vm78_vm3 = vweird.f32 %v71_v23 }
 0x18c   :  { %v107_v24 = vpop.eup %106 }
 0x18d   :  { %v73_v25 = vmul.f32 %v107_v24, %v71_v23  ;;  %vm79_vm2 = vweird.f32 %v107_v24 }
 0x18e   :  { %vm80_vm4 = vmor %vm78_vm3, %vm79_vm2 }
 0x18f   :  { %v74_v26 = vmul.f32 %v107_v24, %v73_v25 }
 0x191   :  { %v75_v27 = vmul.f32 0.5, %v74_v26 }
 0x193   :  { %v76_v28 = vsub.f32 1.5, %v75_v27 }
 0x195   :  { %v77_v30 = vmul.f32 %v107_v24, %v76_v28 }
 0x197   :  { %v81_v31 = vsel %vm80_vm4, %v107_v24, %v77_v30 }
 0x198   :  { %v82_v32 = vmul.f32 %v81_v31, %v70_v29 }
 0x19a   :  { %85 = vperm.xlu1 %104, %v82_v32  }
 0x20c   :  { %v86_v33 = vpop.permute.xlu1 %85 }
 0x20d   :  { %v88_v35 = vmul.f32 %v86_v33, %v65_v18 }
 0x20f   :  { %v95_v36 = vadd.f32 %v93_v34, %v88_v35 }
 0x211   :  { %96 = vst [vmem:[%s183_s5] sm:$0xff] %v95_v36 }

// kernel: _lambda_.5
= control target key start
LH: loop header
LB: loop body
LE: loop exit
PB: predicated region body
PF: predicated region fallthrough
CT: control target
= control target key end

     0   :  { %v182_v3 = vmov 0   ;;  %vm79_vm1 = vcmask 261120   ;;  %s297_s1 = inlined_call_operand.vmem [shape: f32[128,32], index: 1, kind: input, shape index: {}]   ;;  %s298_s2 = inlined_call_operand.vmem [shape: f32[16,1], index: 2, kind: input, shape index: {}]   ;;  %s299_s0 = inlined_call_operand.vmem [shape: f32[16,128], index: 0, kind: input, shape index: {}]   ;;  %s300_s4 = inlined_call_operand.vmem [shape: f32[16,1], index: 4, kind: input, shape index: {}]   ;;  %s301_s3 = inlined_call_operand.vmem [shape: f32[16,1], index: 3, kind: input, shape index: {}]   ;;  %s302_s5 = inlined_call_operand.vmem [shape: f32[16,32], index: 5, kind: output, shape index: {}]  }
   0x1   :  { %v37_v0 = vld [vmem:[%s297_s1 + $0x78] sm:$0xff]  ;;  %v36_v1 = vld [vmem:[%s297_s1 + $0x70] sm:$0xff]  ;;  %v35_v2 = vld [vmem:[%s297_s1 + $0x68] sm:$0xff]  ;;  %175 = vset.pattern.permute.xlu0 %v182_v3  ;;  %176 = vset.pattern.permute.xlu1 %v182_v3 }
   0x2   :  { %50 = vmatpush.msra.mxu0 %v37_v0  ;;  %158 = vmatpush.msra.mxu1 %v37_v0  ;;  %v34_v4 = vld [vmem:[%s297_s1 + $0x60] sm:$0xff]  ;;  %v33_v5 = vld [vmem:[%s297_s1 + $0x58] sm:$0xff]  ;;  %v32_v7 = vld [vmem:[%s297_s1 + $0x50] sm:$0xff] }
   0x3   :  { %177 = vset.pattern.permute.xlu2 %v182_v3  ;;  %v38_v6 = vld [vmem:[%s298_s2] sm:$0xff]  ;;  %v31_v8 = vld [vmem:[%s297_s1 + $0x48] sm:$0xff]  ;;  %v29_v11 = vld [vmem:[%s297_s1 + $0x38] sm:$0xff] }
   0x4   :  { %51 = vmatpush.msra.mxu0 %v36_v1  ;;  %159 = vmatpush.msra.mxu1 %v36_v1  ;;  %v30_v9 = vld [vmem:[%s297_s1 + $0x40] sm:$0xff]  ;;  %v39_v10 = vld [vmem:[%s298_s2 + $0x8] sm:$0xff]  ;;  %v28_v12 = vld [vmem:[%s297_s1 + $0x30] sm:$0xff] }
   0x5   :  { %42 = vperm.xlu0 %175, %v38_v6   ;;  %v27_v13 = vld [vmem:[%s297_s1 + $0x28] sm:$0xff]  ;;  %v26_v14 = vld [vmem:[%s297_s1 + $0x20] sm:$0xff]  ;;  %v25_v15 = vld [vmem:[%s297_s1 + $0x18] sm:$0xff] }
   0x6   :  { %52 = vmatpush.msra.mxu0 %v35_v2  ;;  %160 = vmatpush.msra.mxu1 %v35_v2  ;;  %v24_v16 = vld [vmem:[%s297_s1 + $0x10] sm:$0xff]  ;;  %v23_v17 = vld [vmem:[%s297_s1 + $0x8] sm:$0xff]  ;;  %v22_v18 = vld [vmem:[%s297_s1] sm:$0xff] }
   0x7   :  { %v20_v19 = vld [vmem:[%s299_s0] sm:$0xff]  ;;  %v21_v20 = vld [vmem:[%s299_s0 + $0x8] sm:$0xff] }
   0x8   :  { %53 = vmatpush.msra.mxu0 %v34_v4  ;;  %161 = vmatpush.msra.mxu1 %v34_v4  ;;  %v138_v45 = vld [vmem:[%s300_s4] sm:$0xff]  ;;  %v101_v0 = vld [vmem:[%s301_s3 + $0x8] sm:$0xff] }
   0x9   :  { %v100_v57 = vld [vmem:[%s301_s3] sm:$0xff]  ;;  %v139_v2 = vld [vmem:[%s300_s4 + $0x8] sm:$0xff] }
   0xa   :  { %54 = vmatpush.msra.mxu0 %v33_v5  ;;  %162 = vmatpush.msra.mxu1 %v33_v5 }
   0xc   :  { %55 = vmatpush.msra.mxu0 %v32_v7  ;;  %163 = vmatpush.msra.mxu1 %v32_v7 }
   0xd   :  { %47 = vperm.xlu0 %175, %v39_v10  }
   0xe   :  { %56 = vmatpush.msra.mxu0 %v31_v8  ;;  %164 = vmatpush.msra.mxu1 %v31_v8 }
  0x10   :  { %57 = vmatpush.msra.mxu0 %v30_v9  ;;  %165 = vmatpush.msra.mxu1 %v30_v9 }
  0x12   :  { %58 = vmatpush.msra.mxu0 %v29_v11  ;;  %166 = vmatpush.msra.mxu1 %v29_v11 }
  0x14   :  { %59 = vmatpush.msra.mxu0 %v28_v12  ;;  %167 = vmatpush.msra.mxu1 %v28_v12 }
  0x16   :  { %60 = vmatpush.msra.mxu0 %v27_v13  ;;  %168 = vmatpush.msra.mxu1 %v27_v13 }
  0x18   :  { %61 = vmatpush.msra.mxu0 %v26_v14  ;;  %169 = vmatpush.msra.mxu1 %v26_v14 }
  0x1a   :  { %62 = vmatpush.msra.mxu0 %v25_v15  ;;  %170 = vmatpush.msra.mxu1 %v25_v15 }
  0x1c   :  { %63 = vmatpush.msra.mxu0 %v24_v16  ;;  %171 = vmatpush.msra.mxu1 %v24_v16 }
  0x1e   :  { %64 = vmatpush.msra.mxu0 %v23_v17  ;;  %172 = vmatpush.msra.mxu1 %v23_v17 }
  0x20   :  { %65 = vmatpush.msra.mxu0 %v22_v18  ;;  %173 = vmatpush.msra.mxu1 %v22_v18 }
  0x21   :  { %66 = vmatmul.f32.vlgmr.msra.gmra.mxu0 %v20_v19  ;;  %69 = vmatmul.f32.vlgmr.msra.gmra.mxu1 %v21_v20 }
  0x77   :  { %v43_v21 = vpop.permute.xlu0 %42 }
  0x7f   :  { %v48_v22 = vpop.permute.xlu0 %47 }
  0x9e   :  { %v67_v23 = vpop.f32.mrf.mxu0  ;;  %v70_v24 = vpop.f32.mrf.mxu1 }
  0x9f   :  { %v68_v25 = vadd.f32 %v67_v23, %v43_v21  ;;  %v71_v27 = vadd.f32 %v70_v24, %v48_v22 }
  0xa1   :  { %v75_v26 = vmul.f32 0.2, %v68_v25  ;;  %vm73_vm0 = vcmp.ge.f32.partialorder %v68_v25, 0.0  ;;  %v76_v30 = vmul.f32 0.2, %v71_v27  ;;  %vm74_vm2 = vcmp.ge.f32.partialorder %v71_v27, 0.0 }
  0xa3   :  { %v77_v28 = vsel %vm73_vm0, %v68_v25, %v75_v26  ;;  %v78_v31 = vsel %vm74_vm2, %v71_v27, %v76_v30 }
  0xa4   :  { %v80_v29 = vsel %vm79_vm1, %v77_v28, 0.0  ;;  %v83_v32 = vsel %vm79_vm1, %v78_v31, 0.0 }
  0xa5   :  { %81 = vadd.xlane.f32.xlu1 %v80_v29 }
  0xad   :  { %84 = vadd.xlane.f32.xlu1 %v83_v32 }
 0x118   :  { %v82_v33 = vpop.xlane.xlu1 %81 }
 0x119   :  { %v86_v34 = vmul.f32 0.03125, %v82_v33 }
 0x11b   :  { %v88_v35 = vsub.f32 %v77_v28, %v86_v34 }
 0x11d   :  { %v90_v36 = vmul.f32 %v88_v35, %v88_v35 }
 0x11f   :  { %v92_v37 = vsel %vm79_vm1, %v90_v36, 0.0 }
 0x120   :  { %93 = vadd.xlane.f32.xlu2 %v92_v37  ;;  %v85_v38 = vpop.xlane.xlu1 %84 }
 0x121   :  { %v87_v39 = vmul.f32 0.03125, %v85_v38 }
 0x123   :  { %v89_v40 = vsub.f32 %v78_v31, %v87_v39 }
 0x125   :  { %v91_v41 = vmul.f32 %v89_v40, %v89_v40 }
 0x127   :  { %v95_v42 = vsel %vm79_vm1, %v91_v41, 0.0 }
 0x128   :  { %96 = vadd.xlane.f32.xlu2 %v95_v42 }
 0x140   :  { %142 = vperm.xlu2 %177, %v138_v45  }
 0x193   :  { %v94_v43 = vpop.xlane.xlu2 %93 }
 0x194   :  { %v98_v44 = vmul.f32 0.03125, %v94_v43 }
 0x196   :  { %v102_v46 = vadd.f32 1e-05, %v98_v44 }
 0x198   :  { %178 = vrsqrt.f32 %v102_v46  ;;  %vm110_vm4 = vweird.f32 %v102_v46 }
 0x19b   :  { %v97_v47 = vpop.xlane.xlu2 %96 }
 0x19c   :  { %v99_v48 = vmul.f32 0.03125, %v97_v47 }
 0x19e   :  { %v179_v49 = vpop.eup %178  ;;  %v103_v50 = vadd.f32 1e-05, %v99_v48 }
 0x19f   :  { %v105_v51 = vmul.f32 %v179_v49, %v102_v46  ;;  %vm111_vm3 = vweird.f32 %v179_v49 }
 0x1a0   :  { %180 = vrsqrt.f32 %v103_v50  ;;  %vm112_vm5 = vmor %vm110_vm4, %vm111_vm3  ;;  %vm120_vm7 = vweird.f32 %v103_v50 }
 0x1a1   :  { %v106_v52 = vmul.f32 %v179_v49, %v105_v51 }
 0x1a3   :  { %v107_v53 = vmul.f32 0.5, %v106_v52  ;;  %v143_v6 = vpop.permute.xlu2 %142 }
 0x1a5   :  { %v108_v54 = vsub.f32 1.5, %v107_v53 }
 0x1a6   :  { %v181_v55 = vpop.eup %180 }
 0x1a7   :  { %v115_v56 = vmul.f32 %v181_v55, %v103_v50  ;;  %v109_v58 = vmul.f32 %v179_v49, %v108_v54  ;;  %vm121_vm6 = vweird.f32 %v181_v55 }
 0x1a8   :  { %vm122_vm8 = vmor %vm120_vm7, %vm121_vm6 }
 0x1a9   :  { %v116_v59 = vmul.f32 %v181_v55, %v115_v56  ;;  %v113_v60 = vsel %vm112_vm5, %v179_v49, %v109_v58 }
 0x1aa   :  { %v124_v61 = vmul.f32 %v113_v60, %v100_v57 }
 0x1ab   :  { %v117_v62 = vmul.f32 0.5, %v116_v59 }
 0x1ac   :  { %128 = vperm.xlu0 %175, %v124_v61  }
 0x1ad   :  { %v118_v63 = vsub.f32 1.5, %v117_v62 }
 0x1af   :  { %v119_v1 = vmul.f32 %v181_v55, %v118_v63 }
 0x1b1   :  { %v123_v3 = vsel %vm122_vm8, %v181_v55, %v119_v1 }
 0x1b2   :  { %v125_v4 = vmul.f32 %v123_v3, %v101_v0 }
 0x1b4   :  { %147 = vperm.xlu0 %175, %v139_v2   ;;  %133 = vperm.xlu1 %176, %v125_v4  }
 0x21e   :  { %v129_v5 = vpop.permute.xlu0 %128 }
 0x21f   :  { %v136_v7 = vmul.f32 %v129_v5, %v88_v35 }
 0x221   :  { %v150_v8 = vadd.f32 %v143_v6, %v136_v7 }
 0x223   :  { %152 = vst.msk [vmem:[%s302_s5] sm:$0xff] %vm79_vm1, %v150_v8 }
 0x226   :  { %v134_v9 = vpop.permute.xlu1 %133  ;;  %v148_v11 = vpop.permute.xlu0 %147 }
 0x227   :  { %v137_v10 = vmul.f32 %v134_v9, %v89_v40 }
 0x229   :  { %v151_v12 = vadd.f32 %v148_v11, %v137_v10 }
 0x22b   :  { %153 = vst.msk [vmem:[%s302_s5 + $0x8] sm:$0xff] %vm79_vm1, %v151_v12 }

// kernel: _lambda_.6
= control target key start
LH: loop header
LB: loop body
LE: loop exit
PB: predicated region body
PF: predicated region fallthrough
CT: control target
= control target key end

     0   :  { %v351_v37 = vmov 0   ;;  %vm154_vm1 = vcmask 64512   ;;  %s582_s1 = inlined_call_operand.vmem [shape: f32[256,8], index: 1, kind: input, shape index: {}]   ;;  %s583_s0 = inlined_call_operand.vmem [shape: f32[32,256], index: 0, kind: input, shape index: {}]   ;;  %s584_s2 = inlined_call_operand.vmem [shape: f32[32,1], index: 2, kind: input, shape index: {}]   ;;  %s585_s4 = inlined_call_operand.vmem [shape: f32[32,1], index: 4, kind: input, shape index: {}]   ;;  %s586_s3 = inlined_call_operand.vmem [shape: f32[32,1], index: 3, kind: input, shape index: {}]   ;;  %s587_s5 = inlined_call_operand.vmem [shape: f32[32,8], index: 5, kind: output, shape index: {}]  }
   0x1   :  { %v43_v0 = vld [vmem:[%s582_s1 + $0x78] sm:$0xff]  ;;  %v42_v1 = vld [vmem:[%s582_s1 + $0x70] sm:$0xff]  ;;  %v41_v4 = vld [vmem:[%s582_s1 + $0x68] sm:$0xff]  ;;  %340 = vset.pattern.permute.xlu0 %v351_v37  ;;  %341 = vset.pattern.permute.xlu1 %v351_v37 }
   0x2   :  { %v59_v2 = vld [vmem:[%s582_s1 + $0xf8] sm:$0xff]  ;;  %84 = vmatpush.msra.mxu0 %v43_v0  ;;  %307 = vmatpush.msra.mxu2 %v43_v0  ;;  %v58_v3 = vld [vmem:[%s582_s1 + $0xf0] sm:$0xff]  ;;  %v57_v5 = vld [vmem:[%s582_s1 + $0xe8] sm:$0xff] }
   0x3   :  { %113 = vmatpush.msra.mxu1 %v59_v2  ;;  %323 = vmatpush.msra.mxu3 %v59_v2  ;;  %v40_v6 = vld [vmem:[%s582_s1 + $0x60] sm:$0xff]  ;;  %v39_v8 = vld [vmem:[%s582_s1 + $0x58] sm:$0xff]  ;;  %v38_v10 = vld [vmem:[%s582_s1 + $0x50] sm:$0xff] }
   0x4   :  { %85 = vmatpush.msra.mxu0 %v42_v1  ;;  %308 = vmatpush.msra.mxu2 %v42_v1  ;;  %v56_v7 = vld [vmem:[%s582_s1 + $0xe0] sm:$0xff]  ;;  %v55_v9 = vld [vmem:[%s582_s1 + $0xd8] sm:$0xff]  ;;  %v54_v11 = vld [vmem:[%s582_s1 + $0xd0] sm:$0xff] }
   0x5   :  { %114 = vmatpush.msra.mxu1 %v58_v3  ;;  %324 = vmatpush.msra.mxu3 %v58_v3  ;;  %v37_v12 = vld [vmem:[%s582_s1 + $0x48] sm:$0xff]  ;;  %v36_v14 = vld [vmem:[%s582_s1 + $0x40] sm:$0xff]  ;;  %v35_v16 = vld [vmem:[%s582_s1 + $0x38] sm:$0xff] }
   0x6   :  { %86 = vmatpush.msra.mxu0 %v41_v4  ;;  %309 = vmatpush.msra.mxu2 %v41_v4  ;;  %v53_v13 = vld [vmem:[%s582_s1 + $0xc8] sm:$0xff]  ;;  %v52_v15 = vld [vmem:[%s582_s1 + $0xc0] sm:$0xff]  ;;  %v51_v17 = vld [vmem:[%s582_s1 + $0xb8] sm:$0xff] }
   0x7   :  { %115 = vmatpush.msra.mxu1 %v57_v5  ;;  %325 = vmatpush.msra.mxu3 %v57_v5  ;;  %v34_v18 = vld [vmem:[%s582_s1 + $0x30] sm:$0xff]  ;;  %v33_v20 = vld [vmem:[%s582_s1 + $0x28] sm:$0xff]  ;;  %v32_v22 = vld [vmem:[%s582_s1 + $0x20] sm:$0xff] }
   0x8   :  { %87 = vmatpush.msra.mxu0 %v40_v6  ;;  %310 = vmatpush.msra.mxu2 %v40_v6  ;;  %v50_v19 = vld [vmem:[%s582_s1 + $0xb0] sm:$0xff]  ;;  %v49_v21 = vld [vmem:[%s582_s1 + $0xa8] sm:$0xff]  ;;  %v48_v23 = vld [vmem:[%s582_s1 + $0xa0] sm:$0xff] }
   0x9   :  { %116 = vmatpush.msra.mxu1 %v56_v7  ;;  %326 = vmatpush.msra.mxu3 %v56_v7  ;;  %v31_v24 = vld [vmem:[%s582_s1 + $0x18] sm:$0xff]  ;;  %v30_v26 = vld [vmem:[%s582_s1 + $0x10] sm:$0xff]  ;;  %v29_v28 = vld [vmem:[%s582_s1 + $0x8] sm:$0xff] }
   0xa   :  { %88 = vmatpush.msra.mxu0 %v39_v8  ;;  %311 = vmatpush.msra.mxu2 %v39_v8  ;;  %v47_v25 = vld [vmem:[%s582_s1 + $0x98] sm:$0xff]  ;;  %v46_v27 = vld [vmem:[%s582_s1 + $0x90] sm:$0xff]  ;;  %v45_v29 = vld [vmem:[%s582_s1 + $0x88] sm:$0xff] }
   0xb   :  { %117 = vmatpush.msra.mxu1 %v55_v9  ;;  %327 = vmatpush.msra.mxu3 %v55_v9  ;;  %v28_v30 = vld [vmem:[%s582_s1] sm:$0xff]  ;;  %v21_v34 = vld [vmem:[%s583_s0 + $0x8] sm:$0xff]  ;;  %v62_v38 = vld [vmem:[%s584_s2 + $0x10] sm:$0xff] }
   0xc   :  { %89 = vmatpush.msra.mxu0 %v38_v10  ;;  %312 = vmatpush.msra.mxu2 %v38_v10  ;;  %v20_v31 = vld [vmem:[%s583_s0] sm:$0xff]  ;;  %v25_v35 = vld [vmem:[%s583_s0 + $0x28] sm:$0xff]  ;;  %v22_v39 = vld [vmem:[%s583_s0 + $0x10] sm:$0xff] }
   0xd   :  { %118 = vmatpush.msra.mxu1 %v54_v11  ;;  %328 = vmatpush.msra.mxu3 %v54_v11  ;;  %v24_v32 = vld [vmem:[%s583_s0 + $0x20] sm:$0xff]  ;;  %v26_v40 = vld [vmem:[%s583_s0 + $0x30] sm:$0xff]  ;;  %v23_v41 = vld [vmem:[%s583_s0 + $0x18] sm:$0xff] }
   0xe   :  { %90 = vmatpush.msra.mxu0 %v37_v12  ;;  %313 = vmatpush.msra.mxu2 %v37_v12  ;;  %v44_v33 = vld [vmem:[%s582_s1 + $0x80] sm:$0xff]  ;;  %v27_v42 = vld [vmem:[%s583_s0 + $0x38] sm:$0xff]  ;;  %v61_v43 = vld [vmem:[%s584_s2 + $0x8] sm:$0xff] }
   0xf   :  { %119 = vmatpush.msra.mxu1 %v53_v13  ;;  %329 = vmatpush.msra.mxu3 %v53_v13  ;;  %v60_v36 = vld [vmem:[%s584_s2] sm:$0xff]  ;;  %v63_v44 = vld [vmem:[%s584_s2 + $0x18] sm:$0xff] }
  0x10   :  { %91 = vmatpush.msra.mxu0 %v36_v14  ;;  %314 = vmatpush.msra.mxu2 %v36_v14  ;;  %v271_v13 = vld [vmem:[%s585_s4] sm:$0xff] }
  0x11   :  { %120 = vmatpush.msra.mxu1 %v52_v15  ;;  %330 = vmatpush.msra.mxu3 %v52_v15 }
  0x12   :  { %92 = vmatpush.msra.mxu0 %v35_v16  ;;  %315 = vmatpush.msra.mxu2 %v35_v16 }
  0x13   :  { %121 = vmatpush.msra.mxu1 %v51_v17  ;;  %331 = vmatpush.msra.mxu3 %v51_v17 }
  0x14   :  { %93 = vmatpush.msra.mxu0 %v34_v18  ;;  %316 = vmatpush.msra.mxu2 %v34_v18 }
  0x15   :  { %122 = vmatpush.msra.mxu1 %v50_v19  ;;  %332 = vmatpush.msra.mxu3 %v50_v19 }
  0x16   :  { %94 = vmatpush.msra.mxu0 %v33_v20  ;;  %317 = vmatpush.msra.mxu2 %v33_v20 }
  0x17   :  { %123 = vmatpush.msra.mxu1 %v49_v21  ;;  %333 = vmatpush.msra.mxu3 %v49_v21 }
  0x18   :  { %95 = vmatpush.msra.mxu0 %v32_v22  ;;  %318 = vmatpush.msra.mxu2 %v32_v22 }
  0x19   :  { %124 = vmatpush.msra.mxu1 %v48_v23  ;;  %334 = vmatpush.msra.mxu3 %v48_v23 }
  0x1a   :  { %96 = vmatpush.msra.mxu0 %v31_v24  ;;  %319 = vmatpush.msra.mxu2 %v31_v24 }
  0x1b   :  { %125 = vmatpush.msra.mxu1 %v47_v25  ;;  %335 = vmatpush.msra.mxu3 %v47_v25 }
  0x1c   :  { %97 = vmatpush.msra.mxu0 %v30_v26  ;;  %320 = vmatpush.msra.mxu2 %v30_v26 }
  0x1d   :  { %126 = vmatpush.msra.mxu1 %v46_v27  ;;  %336 = vmatpush.msra.mxu3 %v46_v27 }
  0x1e   :  { %98 = vmatpush.msra.mxu0 %v29_v28  ;;  %321 = vmatpush.msra.mxu2 %v29_v28 }
  0x1f   :  { %127 = vmatpush.msra.mxu1 %v45_v29  ;;  %337 = vmatpush.msra.mxu3 %v45_v29 }
  0x20   :  { %99 = vmatpush.msra.mxu0 %v28_v30  ;;  %322 = vmatpush.msra.mxu2 %v28_v30 }
  0x21   :  { %100 = vmatmul.f32.vlgmr.msra.gmra.mxu0 %v20_v31  ;;  %106 = vmatmul.f32.vlgmr.msra.gmra.mxu2 %v24_v32 }
  0x22   :  { %128 = vmatpush.msra.mxu1 %v44_v33  ;;  %338 = vmatpush.msra.mxu3 %v44_v33 }
  0x23   :  { %129 = vmatmul.f32.vlgmr.msra.gmra.mxu1 %v21_v34  ;;  %135 = vmatmul.f32.vlgmr.msra.gmra.mxu3 %v25_v35 }
  0x24   :  { %66 = vperm.xlu0 %340, %v60_v36   ;;  %342 = vset.pattern.permute.xlu2 %v351_v37 }
  0x25   :  { %76 = vperm.xlu1 %341, %v62_v38  }
  0x29   :  { %103 = vmatmul.f32.gmra.mxu0 %v22_v39  ;;  %109 = vmatmul.f32.gmra.mxu2 %v26_v40 }
  0x2b   :  { %132 = vmatmul.f32.gmra.mxu1 %v23_v41  ;;  %138 = vmatmul.f32.gmra.mxu3 %v27_v42 }
  0x2c   :  { %71 = vperm.xlu0 %340, %v61_v43  }
  0x2d   :  { %81 = vperm.xlu1 %341, %v63_v44  }
  0x96   :  { %v67_v45 = vpop.permute.xlu0 %66 }
  0x97   :  { %v77_v50 = vpop.permute.xlu1 %76 }
  0x9e   :  { %v101_v46 = vpop.f32.mrf.mxu0  ;;  %v72_v55 = vpop.permute.xlu0 %71 }
  0x9f   :  { %v102_v47 = vadd.f32 %v101_v46, %v67_v45  ;;  %v82_v1 = vpop.permute.xlu1 %81 }
  0xa0   :  { %v130_v48 = vpop.f32.mrf.mxu1 }
  0xa1   :  { %v131_v49 = vadd.f32 %v130_v48, %v102_v47 }
  0xa3   :  { %v146_v51 = vmul.f32 0.2, %v131_v49  ;;  %vm142_vm0 = vcmp.ge.f32.partialorder %v131_v49, 0.0 }
  0xa4   :  { %v107_v52 = vpop.f32.mrf.mxu2 }
  0xa5   :  { %v108_v53 = vadd.f32 %v107_v52, %v77_v50  ;;  %v150_v54 = vsel %vm142_vm0, %v131_v49, %v146_v51  ;;  %v195_v50 = vld [vmem:[%s586_s3] sm:$0xff] }
  0xa6   :  { %v104_v56 = vpop.f32.mrf.mxu0  ;;  %v155_v57 = vsel %vm154_vm1, %v150_v54, 0.0  ;;  %v136_v59 = vpop.f32.mrf.mxu3 }
  0xa7   :  { %v105_v58 = vadd.f32 %v104_v56, %v72_v55  ;;  %156 = vadd.xlane.f32.xlu2 %v155_v57  ;;  %v137_v60 = vadd.f32 %v136_v59, %v108_v53 }
  0xa8   :  { %v133_v61 = vpop.f32.mrf.mxu1 }
  0xa9   :  { %v134_v62 = vadd.f32 %v133_v61, %v105_v58  ;;  %v148_v63 = vmul.f32 0.2, %v137_v60  ;;  %vm144_vm2 = vcmp.ge.f32.partialorder %v137_v60, 0.0 }
  0xab   :  { %v147_v0 = vmul.f32 0.2, %v134_v62  ;;  %vm143_vm3 = vcmp.ge.f32.partialorder %v134_v62, 0.0  ;;  %v152_v3 = vsel %vm144_vm2, %v137_v60, %v148_v63 }
  0xac   :  { %v110_v2 = vpop.f32.mrf.mxu2  ;;  %v161_v5 = vsel %vm154_vm1, %v152_v3, 0.0 }
  0xad   :  { %v111_v4 = vadd.f32 %v110_v2, %v82_v1  ;;  %v151_v6 = vsel %vm143_vm3, %v134_v62, %v147_v0  ;;  %162 = vadd.xlane.f32.xlu0 %v161_v5  ;;  %v197_v62 = vld [vmem:[%s586_s3 + $0x10] sm:$0xff] }
  0xae   :  { %v158_v7 = vsel %vm154_vm1, %v151_v6, 0.0  ;;  %v139_v8 = vpop.f32.mrf.mxu3 }
  0xaf   :  { %159 = vadd.xlane.f32.xlu2 %v158_v7  ;;  %v140_v9 = vadd.f32 %v139_v8, %v111_v4  ;;  %v196_v7 = vld [vmem:[%s586_s3 + $0x8] sm:$0xff] }
  0xb1   :  { %v149_v10 = vmul.f32 0.2, %v140_v9  ;;  %vm145_vm4 = vcmp.ge.f32.partialorder %v140_v9, 0.0 }
  0xb3   :  { %v153_v11 = vsel %vm145_vm4, %v140_v9, %v149_v10  ;;  %v273_v10 = vld [vmem:[%s585_s4 + $0x10] sm:$0xff] }
  0xb4   :  { %v164_v12 = vsel %vm154_vm1, %v153_v11, 0.0 }
  0xb5   :  { %165 = vadd.xlane.f32.xlu1 %v164_v12 }
  0xc1   :  { %277 = vperm.xlu0 %340, %v271_v13  }
 0x11a   :  { %v157_v14 = vpop.xlane.xlu2 %156 }
 0x11b   :  { %v167_v15 = vmul.f32 0.125, %v157_v14 }
 0x11d   :  { %v521_v16 = vsub.f32 %v150_v54, %v167_v15  ;;  %v198_v15 = vld [vmem:[%s586_s3 + $0x18] sm:$0xff] }
 0x11f   :  { %v175_v17 = vmul.f32 %v521_v16, %v521_v16 }
 0x120   :  { %v163_v18 = vpop.xlane.xlu0 %162 }
 0x121   :  { %v179_v19 = vsel %vm154_vm1, %v175_v17, 0.0  ;;  %v169_v20 = vmul.f32 0.125, %v163_v18  ;;  %v274_v18 = vld [vmem:[%s585_s4 + $0x18] sm:$0xff] }
 0x122   :  { %180 = vadd.xlane.f32.xlu2 %v179_v19  ;;  %v160_v21 = vpop.xlane.xlu2 %159 }
 0x123   :  { %v526_v22 = vsub.f32 %v152_v3, %v169_v20  ;;  %v168_v23 = vmul.f32 0.125, %v160_v21  ;;  %v272_v21 = vld [vmem:[%s585_s4 + $0x8] sm:$0xff] }
 0x125   :  { %v177_v24 = vmul.f32 %v526_v22, %v526_v22  ;;  %v530_v25 = vsub.f32 %v151_v6, %v168_v23 }
 0x127   :  { %v185_v26 = vsel %vm154_vm1, %v177_v24, 0.0  ;;  %v176_v29 = vmul.f32 %v530_v25, %v530_v25 }
 0x128   :  { %v166_v27 = vpop.xlane.xlu1 %165 }
 0x129   :  { %v170_v28 = vmul.f32 0.125, %v166_v27  ;;  %v182_v31 = vsel %vm154_vm1, %v176_v29, 0.0 }
 0x12a   :  { %186 = vadd.xlane.f32.xlu2 %v185_v26 }
 0x12b   :  { %v535_v30 = vsub.f32 %v153_v11, %v170_v28 }
 0x12d   :  { %v178_v32 = vmul.f32 %v535_v30, %v535_v30 }
 0x12f   :  { %v188_v33 = vsel %vm154_vm1, %v178_v32, 0.0 }
 0x132   :  { %183 = vadd.xlane.f32.xlu2 %v182_v31 }
 0x133   :  { %v278_v26 = vpop.permute.xlu0 %277 }
 0x13a   :  { %189 = vadd.xlane.f32.xlu2 %v188_v33 }
 0x195   :  { %v181_v34 = vpop.xlane.xlu2 %180 }
 0x196   :  { %v191_v35 = vmul.f32 0.125, %v181_v34 }
 0x198   :  { %v199_v36 = vadd.f32 1e-05, %v191_v35 }
 0x19a   :  { %343 = vrsqrt.f32 %v199_v36  ;;  %vm209_vm6 = vweird.f32 %v199_v36 }
 0x19d   :  { %v187_v37 = vpop.xlane.xlu2 %186 }
 0x19e   :  { %v193_v38 = vmul.f32 0.125, %v187_v37 }
 0x1a0   :  { %v344_v39 = vpop.eup %343  ;;  %v201_v40 = vadd.f32 1e-05, %v193_v38 }
 0x1a1   :  { %v204_v41 = vmul.f32 %v344_v39, %v199_v36  ;;  %vm210_vm5 = vweird.f32 %v344_v39 }
 0x1a2   :  { %345 = vrsqrt.f32 %v201_v40  ;;  %vm211_vm7 = vmor %vm209_vm6, %vm210_vm5  ;;  %vm229_vm9 = vweird.f32 %v201_v40 }
 0x1a3   :  { %v205_v42 = vmul.f32 %v344_v39, %v204_v41 }
 0x1a5   :  { %v206_v43 = vmul.f32 0.5, %v205_v42  ;;  %v184_v44 = vpop.xlane.xlu2 %183 }
 0x1a6   :  { %v192_v45 = vmul.f32 0.125, %v184_v44 }
 0x1a7   :  { %v207_v46 = vsub.f32 1.5, %v206_v43 }
 0x1a8   :  { %v346_v47 = vpop.eup %345  ;;  %v200_v48 = vadd.f32 1e-05, %v192_v45 }
 0x1a9   :  { %v224_v49 = vmul.f32 %v346_v47, %v201_v40  ;;  %v208_v51 = vmul.f32 %v344_v39, %v207_v46  ;;  %vm230_vm8 = vweird.f32 %v346_v47 }
 0x1aa   :  { %347 = vrsqrt.f32 %v200_v48  ;;  %vm231_vm10 = vmor %vm229_vm9, %vm230_vm8  ;;  %vm219_vm12 = vweird.f32 %v200_v48 }
 0x1ab   :  { %v225_v52 = vmul.f32 %v346_v47, %v224_v49  ;;  %v212_v53 = vsel %vm211_vm7, %v344_v39, %v208_v51 }
 0x1ac   :  { %v243_v54 = vmul.f32 %v212_v53, %v195_v50 }
 0x1ad   :  { %v226_v55 = vmul.f32 0.5, %v225_v52  ;;  %v190_v56 = vpop.xlane.xlu2 %189 }
 0x1ae   :  { %v194_v57 = vmul.f32 0.125, %v190_v56  ;;  %249 = vperm.xlu2 %342, %v243_v54  }
 0x1af   :  { %v227_v58 = vsub.f32 1.5, %v226_v55 }
 0x1b0   :  { %v348_v59 = vpop.eup %347  ;;  %v202_v60 = vadd.f32 1e-05, %v194_v57 }
 0x1b1   :  { %v214_v61 = vmul.f32 %v348_v59, %v200_v48  ;;  %v228_v63 = vmul.f32 %v346_v47, %v227_v58  ;;  %vm220_vm11 = vweird.f32 %v348_v59 }
 0x1b2   :  { %349 = vrsqrt.f32 %v202_v60  ;;  %vm221_vm13 = vmor %vm219_vm12, %vm220_vm11  ;;  %vm239_vm15 = vweird.f32 %v202_v60 }
 0x1b3   :  { %v215_v0 = vmul.f32 %v348_v59, %v214_v61  ;;  %v232_v1 = vsel %vm231_vm10, %v346_v47, %v228_v63 }
 0x1b4   :  { %v245_v2 = vmul.f32 %v232_v1, %v197_v62 }
 0x1b5   :  { %v216_v3 = vmul.f32 0.5, %v215_v0 }
 0x1b6   :  { %259 = vperm.xlu1 %341, %v245_v2  }
 0x1b7   :  { %v217_v4 = vsub.f32 1.5, %v216_v3 }
 0x1b8   :  { %v350_v5 = vpop.eup %349 }
 0x1b9   :  { %v234_v6 = vmul.f32 %v350_v5, %v202_v60  ;;  %v218_v8 = vmul.f32 %v348_v59, %v217_v4  ;;  %vm240_vm14 = vweird.f32 %v350_v5 }
 0x1ba   :  { %vm241_vm0 = vmor %vm239_vm15, %vm240_vm14 }
 0x1bb   :  { %v235_v9 = vmul.f32 %v350_v5, %v234_v6  ;;  %v222_v11 = vsel %vm221_vm13, %v348_v59, %v218_v8 }
 0x1bc   :  { %v244_v12 = vmul.f32 %v222_v11, %v196_v7 }
 0x1bd   :  { %v236_v13 = vmul.f32 0.5, %v235_v9 }
 0x1be   :  { %287 = vperm.xlu1 %341, %v273_v10   ;;  %254 = vperm.xlu0 %340, %v244_v12  }
 0x1bf   :  { %v237_v14 = vsub.f32 1.5, %v236_v13 }
 0x1c1   :  { %v238_v17 = vmul.f32 %v350_v5, %v237_v14 }
 0x1c3   :  { %v242_v19 = vsel %vm241_vm0, %v350_v5, %v238_v17 }
 0x1c4   :  { %v246_v20 = vmul.f32 %v242_v19, %v198_v15 }
 0x1c6   :  { %292 = vperm.xlu0 %340, %v274_v18   ;;  %264 = vperm.xlu2 %342, %v246_v20  }
 0x1ce   :  { %282 = vperm.xlu2 %342, %v272_v21  }
 0x208   :  { %v250_v23 = vpop.permute.xlu2 %249 }
 0x209   :  { %v267_v24 = vmul.f32 %v250_v23, %v521_v16 }
 0x20b   :  { %v295_v27 = vadd.f32 %v278_v26, %v267_v24 }
 0x20d   :  { %299 = vst.msk [vmem:[%s587_s5] sm:$0xff] %vm154_vm1, %v295_v27 }
 0x220   :  { %v265_v28 = vpop.permute.xlu2 %264 }
 0x221   :  { %v270_v37 = vmul.f32 %v265_v28, %v535_v30 }
 0x228   :  { %v260_v29 = vpop.permute.xlu1 %259  ;;  %v283_v36 = vpop.permute.xlu2 %282 }
 0x229   :  { %v269_v31 = vmul.f32 %v260_v29, %v526_v22 }
 0x230   :  { %v288_v32 = vpop.permute.xlu1 %287  ;;  %v255_v33 = vpop.permute.xlu0 %254 }
 0x231   :  { %v297_v34 = vadd.f32 %v288_v32, %v269_v31  ;;  %v268_v35 = vmul.f32 %v255_v33, %v530_v25 }
 0x233   :  { %301 = vst.msk [vmem:[%s587_s5 + $0x10] sm:$0xff] %vm154_vm1, %v297_v34  ;;  %v296_v16 = vadd.f32 %v283_v36, %v268_v35 }
 0x235   :  { %300 = vst.msk [vmem:[%s587_s5 + $0x8] sm:$0xff] %vm154_vm1, %v296_v16 }
 0x238   :  { %v293_v22 = vpop.permute.xlu0 %292 }
 0x239   :  { %v298_v38 = vadd.f32 %v293_v22, %v270_v37 }
 0x23b   :  { %302 = vst.msk [vmem:[%s587_s5 + $0x18] sm:$0xff] %vm154_vm1, %v298_v38 }

// kernel: _lambda_.7
= control target key start
LH: loop header
LB: loop body
LE: loop exit
PB: predicated region body
PF: predicated region fallthrough
CT: control target
= control target key end

     0   :  { %vm352_vm1 = vcmask 15360   ;;  %s1182_s1 = inlined_call_operand.vmem [shape: f32[512,2], index: 1, kind: input, shape index: {}]   ;;  %s1183_s0 = inlined_call_operand.vmem [shape: f32[64,512], index: 0, kind: input, shape index: {}]   ;;  %s1184_s2 = inlined_call_operand.vmem [shape: f32[64,1], index: 2, kind: input, shape index: {}]   ;;  %s1185_s4 = inlined_call_operand.vmem [shape: f32[64,1], index: 4, kind: input, shape index: {}]   ;;  %s1186_s3 = inlined_call_operand.vmem [shape: f32[64,1], index: 3, kind: input, shape index: {}]   ;;  %s1187_s5 = inlined_call_operand.vmem [shape: f32[64,2], index: 5, kind: output, shape index: {}]  }
   0x1   :  { %v67_v0 = vld [vmem:[%s1182_s1 + $0x78] sm:$0xff]  ;;  %v66_v2 = vld [vmem:[%s1182_s1 + $0x70] sm:$0xff]  ;;  %v65_v6 = vld [vmem:[%s1182_s1 + $0x68] sm:$0xff] }
   0x2   :  { %v99_v1 = vld [vmem:[%s1182_s1 + $0x178] sm:$0xff]  ;;  %164 = vmatpush.msra.mxu0 %v67_v0  ;;  %v98_v4 = vld [vmem:[%s1182_s1 + $0x170] sm:$0xff]  ;;  %v97_v8 = vld [vmem:[%s1182_s1 + $0x168] sm:$0xff] }
   0x3   :  { %246 = vmatpush.msra.mxu2 %v99_v1  ;;  %v83_v3 = vld [vmem:[%s1182_s1 + $0xf8] sm:$0xff]  ;;  %v82_v7 = vld [vmem:[%s1182_s1 + $0xf0] sm:$0xff]  ;;  %v81_v10 = vld [vmem:[%s1182_s1 + $0xe8] sm:$0xff] }
   0x4   :  { %v115_v5 = vld [vmem:[%s1182_s1 + $0x1f8] sm:$0xff]  ;;  %205 = vmatpush.msra.mxu1 %v83_v3  ;;  %165 = vmatpush.msra.mxu0 %v66_v2  ;;  %v114_v9 = vld [vmem:[%s1182_s1 + $0x1f0] sm:$0xff]  ;;  %v64_v11 = vld [vmem:[%s1182_s1 + $0x60] sm:$0xff] }
   0x5   :  { %287 = vmatpush.msra.mxu3 %v115_v5  ;;  %247 = vmatpush.msra.mxu2 %v98_v4  ;;  %v96_v12 = vld [vmem:[%s1182_s1 + $0x160] sm:$0xff]  ;;  %v113_v13 = vld [vmem:[%s1182_s1 + $0x1e8] sm:$0xff]  ;;  %v63_v16 = vld [vmem:[%s1182_s1 + $0x58] sm:$0xff] }
   0x6   :  { %206 = vmatpush.msra.mxu1 %v82_v7  ;;  %166 = vmatpush.msra.mxu0 %v65_v6  ;;  %v80_v14 = vld [vmem:[%s1182_s1 + $0xe0] sm:$0xff]  ;;  %v95_v17 = vld [vmem:[%s1182_s1 + $0x158] sm:$0xff]  ;;  %v62_v20 = vld [vmem:[%s1182_s1 + $0x50] sm:$0xff]  ;;  %v673_v6 = vmov 0  }
   0x7   :  { %288 = vmatpush.msra.mxu3 %v114_v9  ;;  %248 = vmatpush.msra.mxu2 %v97_v8  ;;  %v112_v15 = vld [vmem:[%s1182_s1 + $0x1e0] sm:$0xff]  ;;  %v79_v18 = vld [vmem:[%s1182_s1 + $0xd8] sm:$0xff]  ;;  %v94_v21 = vld [vmem:[%s1182_s1 + $0x150] sm:$0xff] }
   0x8   :  { %207 = vmatpush.msra.mxu1 %v81_v10  ;;  %167 = vmatpush.msra.mxu0 %v64_v11  ;;  %v111_v19 = vld [vmem:[%s1182_s1 + $0x1d8] sm:$0xff]  ;;  %v78_v22 = vld [vmem:[%s1182_s1 + $0xd0] sm:$0xff]  ;;  %v61_v24 = vld [vmem:[%s1182_s1 + $0x48] sm:$0xff] }
   0x9   :  { %289 = vmatpush.msra.mxu3 %v113_v13  ;;  %249 = vmatpush.msra.mxu2 %v96_v12  ;;  %v110_v23 = vld [vmem:[%s1182_s1 + $0x1d0] sm:$0xff]  ;;  %v93_v25 = vld [vmem:[%s1182_s1 + $0x148] sm:$0xff]  ;;  %v60_v28 = vld [vmem:[%s1182_s1 + $0x40] sm:$0xff] }
   0xa   :  { %208 = vmatpush.msra.mxu1 %v80_v14  ;;  %168 = vmatpush.msra.mxu0 %v63_v16  ;;  %v77_v26 = vld [vmem:[%s1182_s1 + $0xc8] sm:$0xff]  ;;  %v92_v29 = vld [vmem:[%s1182_s1 + $0x140] sm:$0xff]  ;;  %v59_v32 = vld [vmem:[%s1182_s1 + $0x38] sm:$0xff] }
   0xb   :  { %290 = vmatpush.msra.mxu3 %v112_v15  ;;  %250 = vmatpush.msra.mxu2 %v95_v17  ;;  %v109_v27 = vld [vmem:[%s1182_s1 + $0x1c8] sm:$0xff]  ;;  %v76_v30 = vld [vmem:[%s1182_s1 + $0xc0] sm:$0xff]  ;;  %v91_v33 = vld [vmem:[%s1182_s1 + $0x138] sm:$0xff] }
   0xc   :  { %209 = vmatpush.msra.mxu1 %v79_v18  ;;  %169 = vmatpush.msra.mxu0 %v62_v20  ;;  %v108_v31 = vld [vmem:[%s1182_s1 + $0x1c0] sm:$0xff]  ;;  %v75_v34 = vld [vmem:[%s1182_s1 + $0xb8] sm:$0xff]  ;;  %v58_v36 = vld [vmem:[%s1182_s1 + $0x30] sm:$0xff] }
   0xd   :  { %291 = vmatpush.msra.mxu3 %v111_v19  ;;  %251 = vmatpush.msra.mxu2 %v94_v21  ;;  %v107_v35 = vld [vmem:[%s1182_s1 + $0x1b8] sm:$0xff]  ;;  %v90_v37 = vld [vmem:[%s1182_s1 + $0x130] sm:$0xff]  ;;  %v57_v40 = vld [vmem:[%s1182_s1 + $0x28] sm:$0xff] }
   0xe   :  { %210 = vmatpush.msra.mxu1 %v78_v22  ;;  %170 = vmatpush.msra.mxu0 %v61_v24  ;;  %v74_v38 = vld [vmem:[%s1182_s1 + $0xb0] sm:$0xff]  ;;  %v89_v41 = vld [vmem:[%s1182_s1 + $0x128] sm:$0xff]  ;;  %v56_v44 = vld [vmem:[%s1182_s1 + $0x20] sm:$0xff] }
   0xf   :  { %292 = vmatpush.msra.mxu3 %v110_v23  ;;  %252 = vmatpush.msra.mxu2 %v93_v25  ;;  %v106_v39 = vld [vmem:[%s1182_s1 + $0x1b0] sm:$0xff]  ;;  %v73_v42 = vld [vmem:[%s1182_s1 + $0xa8] sm:$0xff]  ;;  %v88_v45 = vld [vmem:[%s1182_s1 + $0x120] sm:$0xff] }
  0x10   :  { %211 = vmatpush.msra.mxu1 %v77_v26  ;;  %171 = vmatpush.msra.mxu0 %v60_v28  ;;  %v105_v43 = vld [vmem:[%s1182_s1 + $0x1a8] sm:$0xff]  ;;  %v72_v46 = vld [vmem:[%s1182_s1 + $0xa0] sm:$0xff]  ;;  %v55_v48 = vld [vmem:[%s1182_s1 + $0x18] sm:$0xff] }
  0x11   :  { %293 = vmatpush.msra.mxu3 %v109_v27  ;;  %253 = vmatpush.msra.mxu2 %v92_v29  ;;  %v104_v47 = vld [vmem:[%s1182_s1 + $0x1a0] sm:$0xff]  ;;  %v87_v49 = vld [vmem:[%s1182_s1 + $0x118] sm:$0xff]  ;;  %v54_v52 = vld [vmem:[%s1182_s1 + $0x10] sm:$0xff] }
  0x12   :  { %212 = vmatpush.msra.mxu1 %v76_v30  ;;  %172 = vmatpush.msra.mxu0 %v59_v32  ;;  %v71_v50 = vld [vmem:[%s1182_s1 + $0x98] sm:$0xff]  ;;  %v86_v53 = vld [vmem:[%s1182_s1 + $0x110] sm:$0xff]  ;;  %v53_v56 = vld [vmem:[%s1182_s1 + $0x8] sm:$0xff] }
  0x13   :  { %294 = vmatpush.msra.mxu3 %v108_v31  ;;  %254 = vmatpush.msra.mxu2 %v91_v33  ;;  %v103_v51 = vld [vmem:[%s1182_s1 + $0x198] sm:$0xff]  ;;  %v70_v54 = vld [vmem:[%s1182_s1 + $0x90] sm:$0xff]  ;;  %v85_v57 = vld [vmem:[%s1182_s1 + $0x108] sm:$0xff] }
  0x14   :  { %213 = vmatpush.msra.mxu1 %v75_v34  ;;  %173 = vmatpush.msra.mxu0 %v58_v36  ;;  %v102_v55 = vld [vmem:[%s1182_s1 + $0x190] sm:$0xff]  ;;  %v69_v58 = vld [vmem:[%s1182_s1 + $0x88] sm:$0xff]  ;;  %v52_v60 = vld [vmem:[%s1182_s1] sm:$0xff] }
  0x15   :  { %295 = vmatpush.msra.mxu3 %v107_v35  ;;  %255 = vmatpush.msra.mxu2 %v90_v37  ;;  %v101_v59 = vld [vmem:[%s1182_s1 + $0x188] sm:$0xff]  ;;  %v84_v61 = vld [vmem:[%s1182_s1 + $0x100] sm:$0xff]  ;;  %v22_v63 = vld [vmem:[%s1183_s0 + $0x10] sm:$0xff] }
  0x16   :  { %214 = vmatpush.msra.mxu1 %v74_v38  ;;  %174 = vmatpush.msra.mxu0 %v57_v40  ;;  %v20_v62 = vld [vmem:[%s1183_s0] sm:$0xff]  ;;  %v21_v2 = vld [vmem:[%s1183_s0 + $0x8] sm:$0xff]  ;;  %v23_v3 = vld [vmem:[%s1183_s0 + $0x18] sm:$0xff] }
  0x17   :  { %296 = vmatpush.msra.mxu3 %v106_v39  ;;  %256 = vmatpush.msra.mxu2 %v89_v41  ;;  %v68_v0 = vld [vmem:[%s1182_s1 + $0x80] sm:$0xff]  ;;  %v118_v5 = vld [vmem:[%s1184_s2 + $0x10] sm:$0xff]  ;;  %v25_v9 = vld [vmem:[%s1183_s0 + $0x28] sm:$0xff] }
  0x18   :  { %215 = vmatpush.msra.mxu1 %v73_v42  ;;  %175 = vmatpush.msra.mxu0 %v56_v44  ;;  %v100_v1 = vld [vmem:[%s1182_s1 + $0x180] sm:$0xff]  ;;  %v26_v8 = vld [vmem:[%s1183_s0 + $0x30] sm:$0xff]  ;;  %v27_v10 = vld [vmem:[%s1183_s0 + $0x38] sm:$0xff] }
  0x19   :  { %297 = vmatpush.msra.mxu3 %v105_v43  ;;  %257 = vmatpush.msra.mxu2 %v88_v45  ;;  %v116_v4 = vld [vmem:[%s1184_s2] sm:$0xff]  ;;  %v117_v11 = vld [vmem:[%s1184_s2 + $0x8] sm:$0xff]  ;;  %v119_v12 = vld [vmem:[%s1184_s2 + $0x18] sm:$0xff] }
  0x1a   :  { %216 = vmatpush.msra.mxu1 %v72_v46  ;;  %176 = vmatpush.msra.mxu0 %v55_v48  ;;  %v24_v7 = vld [vmem:[%s1183_s0 + $0x20] sm:$0xff]  ;;  %v30_v14 = vld [vmem:[%s1183_s0 + $0x50] sm:$0xff]  ;;  %v29_v15 = vld [vmem:[%s1183_s0 + $0x48] sm:$0xff] }
  0x1b   :  { %298 = vmatpush.msra.mxu3 %v104_v47  ;;  %258 = vmatpush.msra.mxu2 %v87_v49  ;;  %v28_v13 = vld [vmem:[%s1183_s0 + $0x40] sm:$0xff]  ;;  %v31_v16 = vld [vmem:[%s1183_s0 + $0x58] sm:$0xff]  ;;  %v122_v17 = vld [vmem:[%s1184_s2 + $0x30] sm:$0xff] }
  0x1c   :  { %217 = vmatpush.msra.mxu1 %v71_v50  ;;  %177 = vmatpush.msra.mxu0 %v54_v52  ;;  %v123_v18 = vld [vmem:[%s1184_s2 + $0x38] sm:$0xff]  ;;  %v32_v19 = vld [vmem:[%s1183_s0 + $0x60] sm:$0xff]  ;;  %v34_v20 = vld [vmem:[%s1183_s0 + $0x70] sm:$0xff] }
  0x1d   :  { %299 = vmatpush.msra.mxu3 %v103_v51  ;;  %259 = vmatpush.msra.mxu2 %v86_v53  ;;  %v33_v21 = vld [vmem:[%s1183_s0 + $0x68] sm:$0xff]  ;;  %v35_v22 = vld [vmem:[%s1183_s0 + $0x78] sm:$0xff]  ;;  %v120_v23 = vld [vmem:[%s1184_s2 + $0x20] sm:$0xff] }
  0x1e   :  { %218 = vmatpush.msra.mxu1 %v70_v54  ;;  %178 = vmatpush.msra.mxu0 %v53_v56  ;;  %v36_v24 = vld [vmem:[%s1183_s0 + $0x80] sm:$0xff]  ;;  %v38_v25 = vld [vmem:[%s1183_s0 + $0x90] sm:$0xff]  ;;  %v37_v26 = vld [vmem:[%s1183_s0 + $0x88] sm:$0xff] }
  0x1f   :  { %300 = vmatpush.msra.mxu3 %v102_v55  ;;  %260 = vmatpush.msra.mxu2 %v85_v57  ;;  %v39_v27 = vld [vmem:[%s1183_s0 + $0x98] sm:$0xff]  ;;  %v121_v28 = vld [vmem:[%s1184_s2 + $0x28] sm:$0xff]  ;;  %v40_v29 = vld [vmem:[%s1183_s0 + $0xa0] sm:$0xff] }
  0x20   :  { %219 = vmatpush.msra.mxu1 %v69_v58  ;;  %179 = vmatpush.msra.mxu0 %v52_v60  ;;  %v42_v30 = vld [vmem:[%s1183_s0 + $0xb0] sm:$0xff]  ;;  %v41_v31 = vld [vmem:[%s1183_s0 + $0xa8] sm:$0xff]  ;;  %v43_v32 = vld [vmem:[%s1183_s0 + $0xb8] sm:$0xff] }
  0x21   :  { %301 = vmatpush.msra.mxu3 %v101_v59  ;;  %261 = vmatpush.msra.mxu2 %v84_v61  ;;  %v44_v33 = vld [vmem:[%s1183_s0 + $0xc0] sm:$0xff]  ;;  %v46_v34 = vld [vmem:[%s1183_s0 + $0xd0] sm:$0xff]  ;;  %v45_v35 = vld [vmem:[%s1183_s0 + $0xc8] sm:$0xff] }
  0x22   :  { %180 = vmatmul.f32.vlgmr.msra.gmra.mxu0 %v20_v62  ;;  %262 = vmatmul.f32.vlgmr.msra.gmra.mxu2 %v22_v63  ;;  %v47_v36 = vld [vmem:[%s1183_s0 + $0xd8] sm:$0xff]  ;;  %v48_v37 = vld [vmem:[%s1183_s0 + $0xe0] sm:$0xff]  ;;  %v50_v38 = vld [vmem:[%s1183_s0 + $0xf0] sm:$0xff] }
  0x23   :  { %220 = vmatpush.msra.mxu1 %v68_v0  ;;  %302 = vmatpush.msra.mxu3 %v100_v1  ;;  %v49_v39 = vld [vmem:[%s1183_s0 + $0xe8] sm:$0xff]  ;;  %v51_v40 = vld [vmem:[%s1183_s0 + $0xf8] sm:$0xff] }
  0x24   :  { %221 = vmatmul.f32.vlgmr.msra.gmra.mxu1 %v21_v2  ;;  %303 = vmatmul.f32.vlgmr.msra.gmra.mxu3 %v23_v3 }
  0x25   :  { %654 = vset.pattern.permute.xlu0 %v673_v6  ;;  %655 = vset.pattern.permute.xlu1 %v673_v6 }
  0x26   :  { %126 = vperm.xlu0 %654, %v116_v4   ;;  %136 = vperm.xlu1 %655, %v118_v5  }
  0x27   :  { %656 = vset.pattern.permute.xlu2 %v673_v6 }
  0x28   :  { %146 = vperm.xlu2 %656, %v120_v23  }
  0x2a   :  { %183 = vmatmul.f32.gmra.mxu0 %v24_v7  ;;  %265 = vmatmul.f32.gmra.mxu2 %v26_v8 }
  0x2c   :  { %224 = vmatmul.f32.gmra.mxu1 %v25_v9  ;;  %306 = vmatmul.f32.gmra.mxu3 %v27_v10 }
  0x2e   :  { %131 = vperm.xlu0 %654, %v117_v11   ;;  %141 = vperm.xlu1 %655, %v119_v12  }
  0x30   :  { %151 = vperm.xlu2 %656, %v121_v28  }
  0x32   :  { %186 = vmatmul.f32.gmra.mxu0 %v28_v13  ;;  %268 = vmatmul.f32.gmra.mxu2 %v30_v14 }
  0x34   :  { %227 = vmatmul.f32.gmra.mxu1 %v29_v15  ;;  %309 = vmatmul.f32.gmra.mxu3 %v31_v16 }
  0x36   :  { %156 = vperm.xlu0 %654, %v122_v17   ;;  %161 = vperm.xlu1 %655, %v123_v18  }
  0x3a   :  { %189 = vmatmul.f32.gmra.mxu0 %v32_v19  ;;  %271 = vmatmul.f32.gmra.mxu2 %v34_v20 }
  0x3c   :  { %230 = vmatmul.f32.gmra.mxu1 %v33_v21  ;;  %312 = vmatmul.f32.gmra.mxu3 %v35_v22 }
  0x42   :  { %192 = vmatmul.f32.gmra.mxu0 %v36_v24  ;;  %274 = vmatmul.f32.gmra.mxu2 %v38_v25 }
  0x44   :  { %233 = vmatmul.f32.gmra.mxu1 %v37_v26  ;;  %315 = vmatmul.f32.gmra.mxu3 %v39_v27 }
  0x4a   :  { %195 = vmatmul.f32.gmra.mxu0 %v40_v29  ;;  %277 = vmatmul.f32.gmra.mxu2 %v42_v30 }
  0x4c   :  { %236 = vmatmul.f32.gmra.mxu1 %v41_v31  ;;  %318 = vmatmul.f32.gmra.mxu3 %v43_v32 }
  0x52   :  { %198 = vmatmul.f32.gmra.mxu0 %v44_v33  ;;  %280 = vmatmul.f32.gmra.mxu2 %v46_v34 }
  0x54   :  { %239 = vmatmul.f32.gmra.mxu1 %v45_v35  ;;  %321 = vmatmul.f32.gmra.mxu3 %v47_v36 }
  0x5a   :  { %201 = vmatmul.f32.gmra.mxu0 %v48_v37  ;;  %283 = vmatmul.f32.gmra.mxu2 %v50_v38 }
  0x5c   :  { %242 = vmatmul.f32.gmra.mxu1 %v49_v39  ;;  %324 = vmatmul.f32.gmra.mxu3 %v51_v40 }
  0x82   :  { %v147_v16 = vpop.permute.xlu2 %146 }
  0x8a   :  { %v152_v31 = vpop.permute.xlu2 %151 }
  0x98   :  { %v127_v41 = vpop.permute.xlu0 %126  ;;  %v137_v56 = vpop.permute.xlu1 %136 }
  0x9f   :  { %v181_v42 = vpop.f32.mrf.mxu0 }
  0xa0   :  { %v182_v43 = vadd.f32 %v181_v42, %v127_v41  ;;  %v132_v47 = vpop.permute.xlu0 %131  ;;  %v142_v7 = vpop.permute.xlu1 %141 }
  0xa1   :  { %v222_v44 = vpop.f32.mrf.mxu1 }
  0xa2   :  { %v223_v45 = vadd.f32 %v222_v44, %v182_v43 }
  0xa5   :  { %v263_v46 = vpop.f32.mrf.mxu2 }
  0xa6   :  { %v264_v48 = vadd.f32 %v263_v46, %v223_v45 }
  0xa7   :  { %v184_v49 = vpop.f32.mrf.mxu0  ;;  %v304_v50 = vpop.f32.mrf.mxu3 }
  0xa8   :  { %v305_v51 = vadd.f32 %v304_v50, %v264_v48  ;;  %v185_v52 = vadd.f32 %v184_v49, %v132_v47  ;;  %v157_v43 = vpop.permute.xlu0 %156 }
  0xa9   :  { %v225_v53 = vpop.f32.mrf.mxu1 }
  0xaa   :  { %v336_v54 = vmul.f32 0.2, %v305_v51  ;;  %v226_v55 = vadd.f32 %v225_v53, %v185_v52  ;;  %vm328_vm0 = vcmp.ge.f32.partialorder %v305_v51, 0.0 }
  0xac   :  { %v1016_v57 = vsel %vm328_vm0, %v305_v51, %v336_v54 }
  0xad   :  { %v266_v58 = vpop.f32.mrf.mxu2  ;;  %v353_v59 = vsel %vm352_vm1, %v1016_v57, 0.0 }
  0xae   :  { %v267_v60 = vadd.f32 %v266_v58, %v226_v55  ;;  %354 = vadd.xlane.f32.xlu2 %v353_v59  ;;  %v162_v55 = vpop.permute.xlu1 %161 }
  0xaf   :  { %v187_v61 = vpop.f32.mrf.mxu0  ;;  %v307_v62 = vpop.f32.mrf.mxu3 }
  0xb0   :  { %v308_v63 = vadd.f32 %v307_v62, %v267_v60  ;;  %v188_v0 = vadd.f32 %v187_v61, %v137_v56 }
  0xb1   :  { %v228_v1 = vpop.f32.mrf.mxu1 }
  0xb2   :  { %v337_v2 = vmul.f32 0.2, %v308_v63  ;;  %v229_v3 = vadd.f32 %v228_v1, %v188_v0  ;;  %vm329_vm2 = vcmp.ge.f32.partialorder %v308_v63, 0.0 }
  0xb4   :  { %v1020_v4 = vsel %vm329_vm2, %v308_v63, %v337_v2 }
  0xb5   :  { %v269_v5 = vpop.f32.mrf.mxu2  ;;  %v356_v6 = vsel %vm352_vm1, %v1020_v4, 0.0 }
  0xb6   :  { %v270_v8 = vadd.f32 %v269_v5, %v229_v3  ;;  %357 = vadd.xlane.f32.xlu0 %v356_v6 }
  0xb7   :  { %v190_v9 = vpop.f32.mrf.mxu0  ;;  %v310_v10 = vpop.f32.mrf.mxu3 }
  0xb8   :  { %v311_v11 = vadd.f32 %v310_v10, %v270_v8  ;;  %v191_v12 = vadd.f32 %v190_v9, %v142_v7 }
  0xb9   :  { %v231_v13 = vpop.f32.mrf.mxu1 }
  0xba   :  { %v338_v14 = vmul.f32 0.2, %v311_v11  ;;  %v232_v15 = vadd.f32 %v231_v13, %v191_v12  ;;  %vm330_vm3 = vcmp.ge.f32.partialorder %v311_v11, 0.0  ;;  %v585_v12 = vld [vmem:[%s1185_s4] sm:$0xff] }
  0xbc   :  { %v1024_v17 = vsel %vm330_vm3, %v311_v11, %v338_v14  ;;  %v586_v11 = vld [vmem:[%s1185_s4 + $0x8] sm:$0xff] }
  0xbd   :  { %v272_v18 = vpop.f32.mrf.mxu2  ;;  %v359_v19 = vsel %vm352_vm1, %v1024_v17, 0.0 }
  0xbe   :  { %v273_v20 = vadd.f32 %v272_v18, %v232_v15  ;;  %360 = vadd.xlane.f32.xlu1 %v359_v19 }
  0xbf   :  { %v193_v21 = vpop.f32.mrf.mxu0  ;;  %v313_v22 = vpop.f32.mrf.mxu3 }
  0xc0   :  { %v314_v23 = vadd.f32 %v313_v22, %v273_v20  ;;  %v194_v24 = vadd.f32 %v193_v21, %v147_v16 }
  0xc1   :  { %v234_v25 = vpop.f32.mrf.mxu1 }
  0xc2   :  { %v339_v26 = vmul.f32 0.2, %v314_v23  ;;  %v235_v27 = vadd.f32 %v234_v25, %v194_v24  ;;  %vm331_vm4 = vcmp.ge.f32.partialorder %v314_v23, 0.0 }
  0xc4   :  { %v1028_v28 = vsel %vm331_vm4, %v314_v23, %v339_v26 }
  0xc5   :  { %v275_v29 = vpop.f32.mrf.mxu2  ;;  %v362_v30 = vsel %vm352_vm1, %v1028_v28, 0.0 }
  0xc6   :  { %v276_v32 = vadd.f32 %v275_v29, %v235_v27  ;;  %363 = vadd.xlane.f32.xlu2 %v362_v30 }
  0xc7   :  { %v196_v33 = vpop.f32.mrf.mxu0  ;;  %v316_v34 = vpop.f32.mrf.mxu3 }
  0xc8   :  { %v317_v35 = vadd.f32 %v316_v34, %v276_v32  ;;  %v197_v36 = vadd.f32 %v196_v33, %v152_v31 }
  0xc9   :  { %v237_v37 = vpop.f32.mrf.mxu1 }
  0xca   :  { %v340_v38 = vmul.f32 0.2, %v317_v35  ;;  %v238_v39 = vadd.f32 %v237_v37, %v197_v36  ;;  %vm332_vm5 = vcmp.ge.f32.partialorder %v317_v35, 0.0 }
  0xcc   :  { %v1032_v40 = vsel %vm332_vm5, %v317_v35, %v340_v38 }
  0xcd   :  { %v278_v41 = vpop.f32.mrf.mxu2  ;;  %v365_v42 = vsel %vm352_vm1, %v1032_v40, 0.0 }
  0xce   :  { %v279_v44 = vadd.f32 %v278_v41, %v238_v39  ;;  %366 = vadd.xlane.f32.xlu2 %v365_v42 }
  0xcf   :  { %v199_v45 = vpop.f32.mrf.mxu0  ;;  %v319_v46 = vpop.f32.mrf.mxu3 }
  0xd0   :  { %v200_v47 = vadd.f32 %v199_v45, %v157_v43  ;;  %v320_v48 = vadd.f32 %v319_v46, %v279_v44 }
  0xd1   :  { %v240_v49 = vpop.f32.mrf.mxu1 }
  0xd2   :  { %v341_v50 = vmul.f32 0.2, %v320_v48  ;;  %vm333_vm6 = vcmp.ge.f32.partialorder %v320_v48, 0.0  ;;  %v241_v51 = vadd.f32 %v240_v49, %v200_v47 }
  0xd4   :  { %v1036_v52 = vsel %vm333_vm6, %v320_v48, %v341_v50 }
  0xd5   :  { %v281_v53 = vpop.f32.mrf.mxu2  ;;  %v368_v54 = vsel %vm352_vm1, %v1036_v52, 0.0 }
  0xd6   :  { %v282_v56 = vadd.f32 %v281_v53, %v241_v51  ;;  %369 = vadd.xlane.f32.xlu0 %v368_v54  ;;  %v587_v51 = vld [vmem:[%s1185_s4 + $0x10] sm:$0xff]  ;;  %v588_v53 = vld [vmem:[%s1185_s4 + $0x18] sm:$0xff] }
  0xd7   :  { %v202_v58 = vpop.f32.mrf.mxu0  ;;  %v322_v59 = vpop.f32.mrf.mxu3 }
  0xd8   :  { %v203_v60 = vadd.f32 %v202_v58, %v162_v55  ;;  %v323_v61 = vadd.f32 %v322_v59, %v282_v56 }
  0xd9   :  { %v243_v62 = vpop.f32.mrf.mxu1 }
  0xda   :  { %v342_v63 = vmul.f32 0.2, %v323_v61  ;;  %vm334_vm7 = vcmp.ge.f32.partialorder %v323_v61, 0.0  ;;  %v244_v0 = vadd.f32 %v243_v62, %v203_v60 }
  0xdc   :  { %v350_v1 = vsel %vm334_vm7, %v323_v61, %v342_v63 }
  0xdd   :  { %v284_v2 = vpop.f32.mrf.mxu2  ;;  %v371_v3 = vsel %vm352_vm1, %v350_v1, 0.0 }
  0xde   :  { %v285_v5 = vadd.f32 %v284_v2, %v244_v0  ;;  %372 = vadd.xlane.f32.xlu1 %v371_v3 }
  0xdf   :  { %v325_v6 = vpop.f32.mrf.mxu3 }
  0xe0   :  { %v326_v7 = vadd.f32 %v325_v6, %v285_v5 }
  0xe2   :  { %v343_v8 = vmul.f32 0.2, %v326_v7  ;;  %vm335_vm8 = vcmp.ge.f32.partialorder %v326_v7, 0.0 }
  0xe4   :  { %v351_v9 = vsel %vm335_vm8, %v326_v7, %v343_v8 }
  0xe5   :  { %v374_v10 = vsel %vm352_vm1, %v351_v9, 0.0 }
  0xe6   :  { %375 = vadd.xlane.f32.xlu2 %v374_v10  ;;  %v433_v10 = vld [vmem:[%s1186_s3] sm:$0xff] }
  0xea   :  { %600 = vperm.xlu0 %654, %v586_v11  }
  0xf7   :  { %595 = vperm.xlu1 %655, %v585_v12  }
 0x121   :  { %v355_v13 = vpop.xlane.xlu2 %354 }
 0x122   :  { %v377_v14 = vmul.f32 0.5, %v355_v13 }
 0x124   :  { %v1049_v15 = vsub.f32 %v1016_v57, %v377_v14 }
 0x126   :  { %v393_v16 = vmul.f32 %v1049_v15, %v1049_v15 }
 0x128   :  { %v401_v18 = vsel %vm352_vm1, %v393_v16, 0.0 }
 0x129   :  { %v358_v19 = vpop.xlane.xlu0 %357  ;;  %402 = vadd.xlane.f32.xlu0 %v401_v18 }
 0x12a   :  { %v378_v20 = vmul.f32 0.5, %v358_v19 }
 0x12c   :  { %v1055_v21 = vsub.f32 %v1020_v4, %v378_v20 }
 0x12e   :  { %v394_v22 = vmul.f32 %v1055_v21, %v1055_v21 }
 0x130   :  { %v404_v23 = vsel %vm352_vm1, %v394_v22, 0.0 }
 0x131   :  { %v361_v24 = vpop.xlane.xlu1 %360  ;;  %405 = vadd.xlane.f32.xlu1 %v404_v23 }
 0x132   :  { %v379_v57 = vmul.f32 0.5, %v361_v24 }
 0x134   :  { %v1061_v25 = vsub.f32 %v1024_v17, %v379_v57  ;;  %v434_v57 = vld [vmem:[%s1186_s3 + $0x8] sm:$0xff] }
 0x136   :  { %v395_v26 = vmul.f32 %v1061_v25, %v1061_v25 }
 0x138   :  { %v407_v27 = vsel %vm352_vm1, %v395_v26, 0.0 }
 0x139   :  { %408 = vadd.xlane.f32.xlu2 %v407_v27  ;;  %v364_v29 = vpop.xlane.xlu2 %363 }
 0x13a   :  { %v380_v4 = vmul.f32 0.5, %v364_v29 }
 0x13c   :  { %v1067_v30 = vsub.f32 %v1028_v28, %v380_v4 }
 0x13e   :  { %v396_v31 = vmul.f32 %v1067_v30, %v1067_v30 }
 0x140   :  { %v410_v32 = vsel %vm352_vm1, %v396_v31, 0.0 }
 0x141   :  { %411 = vadd.xlane.f32.xlu0 %v410_v32  ;;  %v367_v33 = vpop.xlane.xlu2 %366 }
 0x142   :  { %v381_v17 = vmul.f32 0.5, %v367_v33 }
 0x144   :  { %v1073_v34 = vsub.f32 %v1032_v40, %v381_v17 }
 0x146   :  { %v397_v35 = vmul.f32 %v1073_v34, %v1073_v34 }
 0x148   :  { %v413_v36 = vsel %vm352_vm1, %v397_v35, 0.0 }
 0x149   :  { %v370_v37 = vpop.xlane.xlu0 %369  ;;  %414 = vadd.xlane.f32.xlu1 %v413_v36 }
 0x14a   :  { %v382_v28 = vmul.f32 0.5, %v370_v37 }
 0x14c   :  { %v1079_v38 = vsub.f32 %v1036_v52, %v382_v28  ;;  %v589_v52 = vld [vmem:[%s1185_s4 + $0x20] sm:$0xff]  ;;  %v435_v28 = vld [vmem:[%s1186_s3 + $0x10] sm:$0xff] }
 0x14e   :  { %v398_v39 = vmul.f32 %v1079_v38, %v1079_v38 }
 0x150   :  { %v416_v41 = vsel %vm352_vm1, %v398_v39, 0.0 }
 0x151   :  { %v373_v42 = vpop.xlane.xlu1 %372  ;;  %417 = vadd.xlane.f32.xlu2 %v416_v41 }
 0x152   :  { %v383_v40 = vmul.f32 0.5, %v373_v42 }
 0x154   :  { %v1084_v43 = vsub.f32 %v350_v1, %v383_v40 }
 0x156   :  { %v399_v44 = vmul.f32 %v1084_v43, %v1084_v43 }
 0x158   :  { %v419_v45 = vsel %vm352_vm1, %v399_v44, 0.0 }
 0x159   :  { %420 = vadd.xlane.f32.xlu0 %v419_v45  ;;  %v376_v46 = vpop.xlane.xlu2 %375 }
 0x15a   :  { %v384_v47 = vmul.f32 0.5, %v376_v46 }
 0x15c   :  { %v1089_v48 = vsub.f32 %v351_v9, %v384_v47  ;;  %v1103_v54 = vpop.permute.xlu0 %600 }
 0x15e   :  { %v400_v49 = vmul.f32 %v1089_v48, %v1089_v48 }
 0x160   :  { %v422_v50 = vsel %vm352_vm1, %v400_v49, 0.0 }
 0x161   :  { %423 = vadd.xlane.f32.xlu1 %v422_v50 }
 0x169   :  { %605 = vperm.xlu2 %656, %v587_v51   ;;  %v1105_v55 = vpop.permute.xlu1 %595 }
 0x16d   :  { %615 = vperm.xlu0 %654, %v589_v52   ;;  %v436_v52 = vld [vmem:[%s1186_s3 + $0x18] sm:$0xff] }
 0x17a   :  { %610 = vperm.xlu1 %655, %v588_v53  }
 0x19c   :  { %v403_v56 = vpop.xlane.xlu0 %402 }
 0x19d   :  { %v425_v58 = vmul.f32 0.5, %v403_v56 }
 0x19f   :  { %v441_v59 = vadd.f32 1e-05, %v425_v58 }
 0x1a1   :  { %657 = vrsqrt.f32 %v441_v59  ;;  %vm455_vm10 = vweird.f32 %v441_v59 }
 0x1a4   :  { %v406_v60 = vpop.xlane.xlu1 %405 }
 0x1a5   :  { %v426_v61 = vmul.f32 0.5, %v406_v60 }
 0x1a7   :  { %v658_v62 = vpop.eup %657  ;;  %v442_v63 = vadd.f32 1e-05, %v426_v61 }
 0x1a8   :  { %v450_v0 = vmul.f32 %v658_v62, %v441_v59  ;;  %vm456_vm9 = vweird.f32 %v658_v62 }
 0x1a9   :  { %659 = vrsqrt.f32 %v442_v63  ;;  %vm457_vm11 = vmor %vm455_vm10, %vm456_vm9  ;;  %vm465_vm13 = vweird.f32 %v442_v63 }
 0x1aa   :  { %v451_v1 = vmul.f32 %v658_v62, %v450_v0 }
 0x1ac   :  { %v452_v2 = vmul.f32 0.5, %v451_v1  ;;  %v409_v3 = vpop.xlane.xlu2 %408 }
 0x1ad   :  { %v427_v5 = vmul.f32 0.5, %v409_v3  ;;  %v437_v3 = vld [vmem:[%s1186_s3 + $0x20] sm:$0xff] }
 0x1ae   :  { %v453_v6 = vsub.f32 1.5, %v452_v2 }
 0x1af   :  { %v660_v7 = vpop.eup %659  ;;  %v443_v8 = vadd.f32 1e-05, %v427_v5 }
 0x1b0   :  { %v460_v9 = vmul.f32 %v660_v7, %v442_v63  ;;  %v454_v11 = vmul.f32 %v658_v62, %v453_v6  ;;  %vm466_vm12 = vweird.f32 %v660_v7 }
 0x1b1   :  { %661 = vrsqrt.f32 %v443_v8  ;;  %vm467_vm14 = vmor %vm465_vm13, %vm466_vm12  ;;  %vm475_vm0 = vweird.f32 %v443_v8 }
 0x1b2   :  { %v461_v12 = vmul.f32 %v660_v7, %v460_v9  ;;  %v458_v13 = vsel %vm457_vm11, %v658_v62, %v454_v11 }
 0x1b3   :  { %v529_v14 = vmul.f32 %v458_v13, %v433_v10 }
 0x1b4   :  { %v462_v16 = vmul.f32 0.5, %v461_v12  ;;  %v412_v18 = vpop.xlane.xlu0 %411 }
 0x1b5   :  { %v428_v19 = vmul.f32 0.5, %v412_v18  ;;  %539 = vperm.xlu2 %656, %v529_v14   ;;  %v438_v18 = vld [vmem:[%s1186_s3 + $0x28] sm:$0xff] }
 0x1b6   :  { %v463_v20 = vsub.f32 1.5, %v462_v16 }
 0x1b7   :  { %v662_v22 = vpop.eup %661  ;;  %v444_v23 = vadd.f32 1e-05, %v428_v19 }
 0x1b8   :  { %v470_v24 = vmul.f32 %v662_v22, %v443_v8  ;;  %v464_v26 = vmul.f32 %v660_v7, %v463_v20  ;;  %vm476_vm15 = vweird.f32 %v662_v22 }
 0x1b9   :  { %663 = vrsqrt.f32 %v444_v23  ;;  %vm477_vm2 = vmor %vm475_vm0, %vm476_vm15  ;;  %vm485_vm4 = vweird.f32 %v444_v23 }
 0x1ba   :  { %v471_v27 = vmul.f32 %v662_v22, %v470_v24  ;;  %v468_v29 = vsel %vm467_vm14, %v660_v7, %v464_v26 }
 0x1bb   :  { %v530_v4 = vmul.f32 %v468_v29, %v434_v57  ;;  %v439_v29 = vld [vmem:[%s1186_s3 + $0x30] sm:$0xff] }
 0x1bc   :  { %v472_v31 = vmul.f32 0.5, %v471_v27  ;;  %v415_v32 = vpop.xlane.xlu1 %414 }
 0x1bd   :  { %v429_v33 = vmul.f32 0.5, %v415_v32  ;;  %544 = vperm.xlu0 %654, %v530_v4  }
 0x1be   :  { %v473_v17 = vsub.f32 1.5, %v472_v31 }
 0x1bf   :  { %v664_v35 = vpop.eup %663  ;;  %v445_v36 = vadd.f32 1e-05, %v429_v33  ;;  %v591_v33 = vld [vmem:[%s1185_s4 + $0x30] sm:$0xff] }
 0x1c0   :  { %v480_v37 = vmul.f32 %v664_v35, %v444_v23  ;;  %v474_v39 = vmul.f32 %v662_v22, %v473_v17  ;;  %vm486_vm3 = vweird.f32 %v664_v35 }
 0x1c1   :  { %665 = vrsqrt.f32 %v445_v36  ;;  %vm487_vm5 = vmor %vm485_vm4, %vm486_vm3  ;;  %vm495_vm7 = vweird.f32 %v445_v36 }
 0x1c2   :  { %v481_v41 = vmul.f32 %v664_v35, %v480_v37  ;;  %v478_v42 = vsel %vm477_vm2, %v662_v22, %v474_v39  ;;  %v440_v37 = vld [vmem:[%s1186_s3 + $0x38] sm:$0xff] }
 0x1c3   :  { %v531_v40 = vmul.f32 %v478_v42, %v435_v28  ;;  %v592_v39 = vld [vmem:[%s1185_s4 + $0x38] sm:$0xff] }
 0x1c4   :  { %v482_v44 = vmul.f32 0.5, %v481_v41  ;;  %v418_v45 = vpop.xlane.xlu2 %417 }
 0x1c5   :  { %v430_v46 = vmul.f32 0.5, %v418_v45  ;;  %549 = vperm.xlu1 %655, %v531_v40   ;;  %v590_v40 = vld [vmem:[%s1185_s4 + $0x28] sm:$0xff] }
 0x1c6   :  { %v483_v47 = vsub.f32 1.5, %v482_v44 }
 0x1c7   :  { %v666_v49 = vpop.eup %665  ;;  %v446_v50 = vadd.f32 1e-05, %v430_v46 }
 0x1c8   :  { %v490_v51 = vmul.f32 %v666_v49, %v445_v36  ;;  %v484_v53 = vmul.f32 %v664_v35, %v483_v47  ;;  %vm496_vm6 = vweird.f32 %v666_v49 }
 0x1c9   :  { %667 = vrsqrt.f32 %v446_v50  ;;  %vm497_vm8 = vmor %vm495_vm7, %vm496_vm6  ;;  %vm505_vm10 = vweird.f32 %v446_v50 }
 0x1ca   :  { %v491_v56 = vmul.f32 %v666_v49, %v490_v51  ;;  %v488_v58 = vsel %vm487_vm5, %v664_v35, %v484_v53 }
 0x1cb   :  { %v532_v59 = vmul.f32 %v488_v58, %v436_v52 }
 0x1cc   :  { %v492_v60 = vmul.f32 0.5, %v491_v56  ;;  %v421_v61 = vpop.xlane.xlu0 %420  ;;  %v606_v44 = vpop.permute.xlu2 %605 }
 0x1cd   :  { %v431_v62 = vmul.f32 0.5, %v421_v61  ;;  %554 = vperm.xlu0 %654, %v532_v59  }
 0x1ce   :  { %v493_v63 = vsub.f32 1.5, %v492_v60 }
 0x1cf   :  { %v668_v0 = vpop.eup %667  ;;  %v447_v1 = vadd.f32 1e-05, %v431_v62 }
 0x1d0   :  { %v500_v2 = vmul.f32 %v668_v0, %v446_v50  ;;  %v494_v5 = vmul.f32 %v666_v49, %v493_v63  ;;  %vm506_vm9 = vweird.f32 %v668_v0 }
 0x1d1   :  { %669 = vrsqrt.f32 %v447_v1  ;;  %vm507_vm11 = vmor %vm505_vm10, %vm506_vm9  ;;  %vm515_vm13 = vweird.f32 %v447_v1 }
 0x1d2   :  { %v501_v6 = vmul.f32 %v668_v0, %v500_v2  ;;  %v498_v7 = vsel %vm497_vm8, %v666_v49, %v494_v5 }
 0x1d3   :  { %v533_v8 = vmul.f32 %v498_v7, %v437_v3 }
 0x1d4   :  { %v502_v9 = vmul.f32 0.5, %v501_v6  ;;  %v424_v10 = vpop.xlane.xlu1 %423 }
 0x1d5   :  { %v432_v11 = vmul.f32 0.5, %v424_v10  ;;  %559 = vperm.xlu2 %656, %v533_v8  }
 0x1d6   :  { %v503_v12 = vsub.f32 1.5, %v502_v9 }
 0x1d7   :  { %v670_v13 = vpop.eup %669  ;;  %v448_v14 = vadd.f32 1e-05, %v432_v11 }
 0x1d8   :  { %v510_v16 = vmul.f32 %v670_v13, %v447_v1  ;;  %v504_v19 = vmul.f32 %v668_v0, %v503_v12  ;;  %vm516_vm12 = vweird.f32 %v670_v13 }
 0x1d9   :  { %671 = vrsqrt.f32 %v448_v14  ;;  %vm517_vm14 = vmor %vm515_vm13, %vm516_vm12  ;;  %vm525_vm0 = vweird.f32 %v448_v14 }
 0x1da   :  { %v511_v20 = vmul.f32 %v670_v13, %v510_v16  ;;  %v508_v22 = vsel %vm507_vm11, %v668_v0, %v504_v19 }
 0x1db   :  { %v534_v23 = vmul.f32 %v508_v22, %v438_v18 }
 0x1dc   :  { %v512_v24 = vmul.f32 0.5, %v511_v20 }
 0x1dd   :  { %564 = vperm.xlu1 %655, %v534_v23  }
 0x1de   :  { %v513_v57 = vsub.f32 1.5, %v512_v24 }
 0x1df   :  { %v672_v26 = vpop.eup %671  ;;  %v616_v49 = vpop.permute.xlu0 %615 }
 0x1e0   :  { %v520_v27 = vmul.f32 %v672_v26, %v448_v14  ;;  %v514_v4 = vmul.f32 %v670_v13, %v513_v57  ;;  %vm526_vm15 = vweird.f32 %v672_v26 }
 0x1e1   :  { %vm527_vm2 = vmor %vm525_vm0, %vm526_vm15 }
 0x1e2   :  { %v521_v31 = vmul.f32 %v672_v26, %v520_v27  ;;  %v518_v32 = vsel %vm517_vm14, %v670_v13, %v514_v4 }
 0x1e3   :  { %v535_v17 = vmul.f32 %v518_v32, %v439_v29 }
 0x1e4   :  { %v522_v35 = vmul.f32 0.5, %v521_v31 }
 0x1e5   :  { %569 = vperm.xlu0 %654, %v535_v17   ;;  %625 = vperm.xlu1 %655, %v591_v33  }
 0x1e6   :  { %v523_v36 = vsub.f32 1.5, %v522_v35 }
 0x1e8   :  { %v524_v28 = vmul.f32 %v672_v26, %v523_v36 }
 0x1ea   :  { %v528_v41 = vsel %vm527_vm2, %v672_v26, %v524_v28 }
 0x1eb   :  { %v536_v42 = vmul.f32 %v528_v41, %v440_v37 }
 0x1ec   :  { %v611_v50 = vpop.permute.xlu1 %610 }
 0x1ed   :  { %630 = vperm.xlu0 %654, %v592_v39   ;;  %574 = vperm.xlu2 %656, %v536_v42  }
 0x1f5   :  { %620 = vperm.xlu2 %656, %v590_v40  }
 0x20f   :  { %v540_v45 = vpop.permute.xlu2 %539 }
 0x210   :  { %v577_v46 = vmul.f32 %v540_v45, %v1049_v15 }
 0x212   :  { %v633_v47 = vadd.f32 %v1105_v55, %v577_v46 }
 0x214   :  { %641 = vst.msk [vmem:[%s1187_s5] sm:$0xff] %vm352_vm1, %v633_v47 }
 0x22f   :  { %v545_v51 = vpop.permute.xlu0 %544  ;;  %v560_v52 = vpop.permute.xlu2 %559 }
 0x230   :  { %v578_v53 = vmul.f32 %v545_v51, %v1055_v21  ;;  %v581_v56 = vmul.f32 %v560_v52, %v1073_v34 }
 0x232   :  { %v634_v58 = vadd.f32 %v1103_v54, %v578_v53  ;;  %v637_v59 = vadd.f32 %v616_v49, %v581_v56 }
 0x234   :  { %642 = vst.msk [vmem:[%s1187_s5 + $0x8] sm:$0xff] %vm352_vm1, %v634_v58 }
 0x235   :  { %645 = vst.msk [vmem:[%s1187_s5 + $0x20] sm:$0xff] %vm352_vm1, %v637_v59 }
 0x237   :  { %v550_v15 = vpop.permute.xlu1 %549 }
 0x238   :  { %v579_v55 = vmul.f32 %v550_v15, %v1061_v25 }
 0x23a   :  { %v635_v60 = vadd.f32 %v606_v44, %v579_v55 }
 0x23c   :  { %643 = vst.msk [vmem:[%s1187_s5 + $0x10] sm:$0xff] %vm352_vm1, %v635_v60 }
 0x23f   :  { %v555_v21 = vpop.permute.xlu0 %554 }
 0x240   :  { %v580_v34 = vmul.f32 %v555_v21, %v1067_v30 }
 0x242   :  { %v636_v54 = vadd.f32 %v611_v50, %v580_v34 }
 0x244   :  { %644 = vst.msk [vmem:[%s1187_s5 + $0x18] sm:$0xff] %vm352_vm1, %v636_v54 }
 0x247   :  { %v575_v61 = vpop.permute.xlu2 %574 }
 0x248   :  { %v584_v5 = vmul.f32 %v575_v61, %v1089_v48 }
 0x24f   :  { %v565_v62 = vpop.permute.xlu1 %564  ;;  %v621_v25 = vpop.permute.xlu2 %620 }
 0x250   :  { %v582_v63 = vmul.f32 %v565_v62, %v1079_v38 }
 0x252   :  { %v638_v0 = vadd.f32 %v621_v25, %v582_v63 }
 0x254   :  { %646 = vst.msk [vmem:[%s1187_s5 + $0x28] sm:$0xff] %vm352_vm1, %v638_v0 }
 0x257   :  { %v570_v1 = vpop.permute.xlu0 %569  ;;  %v626_v2 = vpop.permute.xlu1 %625 }
 0x258   :  { %v583_v30 = vmul.f32 %v570_v1, %v1084_v43 }
 0x25a   :  { %v639_v3 = vadd.f32 %v626_v2, %v583_v30 }
 0x25c   :  { %647 = vst.msk [vmem:[%s1187_s5 + $0x30] sm:$0xff] %vm352_vm1, %v639_v3 }
 0x25f   :  { %v631_v38 = vpop.permute.xlu0 %630 }
 0x260   :  { %v640_v6 = vadd.f32 %v631_v38, %v584_v5 }
 0x262   :  { %648 = vst.msk [vmem:[%s1187_s5 + $0x38] sm:$0xff] %vm352_vm1, %v640_v6 }

</bundles_post_ra>
